<compile_context>
chip_gen: v7x
topology: tpu7x:2x2x1
jax: 0.10.0
libtpu: 0.0.40
codegen_flags: <defaults>
</compile_context>

<pallas_src>
import jax
import jax.numpy as jnp
from jax.experimental import pallas as pl
from jax.experimental.pallas import tpu as pltpu

K = 5          # maxout pieces
IN0 = 28 * 28  # 784
H1 = 256
H2 = 128


def _disc_kernel(x_ref, w1_ref, b1_ref, w2_ref, b2_ref, w3_ref, b3_ref, o_ref):
    x = x_ref[...].astype(jnp.bfloat16)                         # [TB, 784]

    # --- Maxout(784 -> 256, k=5), no dropout ---------------------------------
    # K per-piece MXU matmuls with a running VPU max; only two [TB, 256] f32
    # tiles are ever live (vs. one [TB, K*256] monolith).
    h = None
    for j in range(K):
        zj = jnp.dot(x, w1_ref[j], preferred_element_type=jnp.float32)
        zj = zj + b1_ref[j]                                     # [TB, 256] f32
        h = zj if h is None else jnp.maximum(h, zj)

    # --- Maxout(256 -> 128, k=5); Dropout(0.5) == identity (eval mode) -------
    # Fused [TB,256]x[256,640] keeps the MXU N dimension full; the [TB,640]
    # f32 intermediate is small. Max over K lane-aligned 128-wide slices.
    z2 = jnp.dot(h.astype(jnp.bfloat16), w2_ref[...],
                 preferred_element_type=jnp.float32)
    z2 = z2 + b2_ref[...]                                       # [TB, 640] f32
    g = z2[:, 0:H2]
    for j in range(1, K):
        g = jnp.maximum(g, z2[:, j * H2:(j + 1) * H2])          # [TB, 128] f32

    # --- Linear(128 -> 1) + Sigmoid ------------------------------------------
    # N=1 would waste an MXU weight push; VPU multiply + cross-lane reduce.
    logit = jnp.sum(g * w3_ref[...], axis=1, keepdims=True) + b3_ref[...]
    o_ref[...] = jax.nn.sigmoid(logit)                          # [TB, 1] f32


def _round_up(v, m):
    return ((v + m - 1) // m) * m


def _resident(shape):
    """Constant-index BlockSpec: block fetched once, resident across the grid."""
    zeros = (0,) * len(shape)
    return pl.BlockSpec(shape, lambda i: zeros)


def _pick_tile(B, block_b):
    """Batch tile: multiple of 8 (sublane), multiple of 256 when the batch
    allows, and >= 2 grid steps for B >= 512 so both v7x TensorCores engage."""
    block_b = max(8, _round_up(block_b, 8))
    b8 = _round_up(B, 8)
    tb = b8 if b8 <= block_b else block_b
    if tb >= 256:
        tb = (tb // 256) * 256
    if B >= 512 and _round_up(B, tb) // tb < 2:
        tb = max(256, _round_up(pl.cdiv(B, 2), 256))
    return tb


def discriminator_forward(x, params, *, block_b=512):
    """x: [B, 784] float32 -> [B, 1] float32 (eval-mode forward).

    block_b: batch-tile size, default 512 (amortizes the ~0.35 us per-grid-step
    overhead; fits the 16 MiB default scoped VMEM on v5e). Larger batches can
    pass a bigger block_b on v6e/v7x; the wrapper raises vmem_limit_bytes
    automatically once the estimated footprint exceeds the 16 MiB default.
    """
    w1p, b1p, w2f, b2f, w3r, b3r = params
    B = x.shape[0]
    TB = _pick_tile(B, block_b)
    Bp = _round_up(B, TB)
    grid = Bp // TB

    # x stays f32 and batch-major in HBM: no host-side transpose/cast pass.
    xp = x if Bp == B else jnp.pad(x, ((0, Bp - B), (0, 0)))

    weight_bytes = ((K * H1 * IN0 + H1 * K * H2) * 2        # bf16 weights
                    + (K * H1 + K * H2 + H2 + 1) * 4)       # f32 biases / w3
    # Rough VMEM footprint: double-buffered x tile + double-buffered residents
    # + live f32 intermediates + lane-padded output blocks + headroom.
    vmem_need = (2 * TB * IN0 * 4
                 + 2 * weight_bytes
                 + TB * (IN0 * 2 + 3 * H1 * 4 + (K * H2 + H2) * 4)
                 + 2 * TB * 128 * 4
                 + (2 << 20))
    vmem_limit = vmem_need if vmem_need > (16 << 20) else None

    cost = pl.CostEstimate(
        flops=2 * Bp * (K * H1 * IN0 + K * H2 * H1 + H2),
        transcendentals=Bp,
        bytes_accessed=Bp * IN0 * 4 + weight_bytes + Bp * 4,
    )

    out = pl.pallas_call(
        _disc_kernel,
        out_shape=jax.ShapeDtypeStruct((Bp, 1), jnp.float32),
        grid=(grid,),
        in_specs=[
            pl.BlockSpec((TB, IN0), lambda i: (i, 0)),   # x batch tile, f32, streamed
            _resident((K, IN0, H1)),                     # W1 per-piece, bf16, resident
            _resident((K, 1, H1)),                       # b1, f32
            _resident((H1, K * H2)),                     # fused W2, bf16, resident
            _resident((1, K * H2)),                      # b2, f32
            _resident((1, H2)),                          # w3 row, f32
            _resident((1, 1)),                           # b3, f32
        ],
        out_specs=pl.BlockSpec((TB, 1), lambda i: (i, 0)),
        compiler_params=pltpu.CompilerParams(
            dimension_semantics=("parallel",),
            vmem_limit_bytes=vmem_limit,
        ),
        cost_estimate=cost,
    )(xp, w1p, b1p, w2f, b2f, w3r, b3r)
    return out[:B]


def init_params(key):
    """Deterministic PyTorch-style Linear init (uniform +-1/sqrt(fan_in))."""
    ks = jax.random.split(key, 6)

    def lin(kw, kb, fan_in, fan_out):
        bound = 1.0 / jnp.sqrt(fan_in)
        w = jax.random.uniform(kw, (fan_out, fan_in), jnp.float32, -bound, bound)
        b = jax.random.uniform(kb, (fan_out,), jnp.float32, -bound, bound)
        return w, b

    # torch shapes: W1 [1280, 784], W2 [640, 256], W3 [1, 128]
    W1, B1 = lin(ks[0], ks[1], IN0, H1 * K)
    W2, B2 = lin(ks[2], ks[3], H1, H2 * K)
    W3, B3 = lin(ks[4], ks[5], H2, 1)

    # Torch Maxout groups as row (unit*K + piece). Repack to:
    #   W1 -> [K, IN0, H1]  (per-piece, IN-major)   w1p[j, :, c] = W1[c*K+j, :]
    #   W2 -> [H1, K*H2]    (fused,   IN-major)     w2f[:, j*H2+c] = W2[c*K+j, :]
    # Big weights in bf16; biases / final linear stay f32.
    w1p = W1.reshape(H1, K, IN0).transpose(1, 2, 0).astype(jnp.bfloat16)  # [5,784,256]
    b1p = B1.reshape(H1, K).T.reshape(K, 1, H1)                           # [5,1,256]
    w2f = (W2.reshape(H2, K, H1).transpose(1, 0, 2)
             .reshape(K * H2, H1).T.astype(jnp.bfloat16))                 # [256,640]
    b2f = B2.reshape(H2, K).T.reshape(1, K * H2)                          # [1,640]
    w3r = W3                                                              # [1,128]
    b3r = B3.reshape(1, 1)                                                # [1,1]
    return (w1p, b1p, w2f, b2f, w3r, b3r), (W1, B1, W2, B2, W3, B3)


def reference_forward(x, torch_params, *, bf16_weights=False):
    """Plain-JAX replica of the PyTorch forward (eval mode, torch layout)."""
    W1, B1, W2, B2, W3, B3 = torch_params

    def mm(a, w):
        if bf16_weights:
            return jnp.dot(a.astype(jnp.bfloat16), w.T.astype(jnp.bfloat16),
                           preferred_element_type=jnp.float32)
        return a @ w.T

    h = mm(x, W1) + B1
    h = h.reshape(h.shape[0], H1, K).max(-1)
    g = mm(h, W2) + B2
    g = g.reshape(g.shape[0], H2, K).max(-1)
    return jax.nn.sigmoid(g @ W3.T + B3)


if __name__ == "__main__":
    key = jax.random.PRNGKey(0)
    kx, kp = jax.random.split(key)

    B = 2
    x = jax.random.normal(kx, (B, IN0), jnp.float32)  # flattened 28x28 MNIST images

    params, torch_params = init_params(kp)

    y = discriminator_forward(x, params)
    y = jax.block_until_ready(y)
    assert y.shape == (B, 1)

    # Tight check against a reference using the same bf16 weight/input precision.
    y_bf = reference_forward(x, torch_params, bf16_weights=True)
    assert jnp.allclose(y, y_bf, atol=1e-3, rtol=1e-3), (y, y_bf)

    # Loose check against the full-f32 PyTorch-layout reference (bf16 weights
    # introduce ~1e-3-level differences in the logits).
    y_f32 = reference_forward(x, torch_params, bf16_weights=False)
    assert jnp.allclose(y, y_f32, atol=2e-2, rtol=0.0), (y, y_f32)

    print("KERNEL_OK")
</pallas_src>

<mosaic_0001>
module attributes {stable_mosaic.version = 11 : i64} {
  func.func @_disc_kernel(%arg0: i32, %arg1: memref<8x784xf32, #tpu.memory_space<vmem>>, %arg2: memref<5x784x256xbf16, #tpu.memory_space<vmem>>, %arg3: memref<5x1x256xf32, #tpu.memory_space<vmem>>, %arg4: memref<256x640xbf16, #tpu.memory_space<vmem>>, %arg5: memref<1x640xf32, #tpu.memory_space<vmem>>, %arg6: memref<1x128xf32, #tpu.memory_space<vmem>>, %arg7: memref<1x1xf32, #tpu.memory_space<vmem>>, %arg8: memref<8x1xf32, #tpu.memory_space<vmem>>) attributes {dimension_semantics = [#tpu.dimension_semantics<parallel>], iteration_bounds = array<i64: 1>, scalar_prefetch = 0 : i64, scratch_operands = 0 : i64, tpu.core_type = #tpu.core_type<tc>, window_params = [{transform_indices = @transform_0, window_bounds = array<i64: 8, 784>}, {pipeline_mode = #tpu.pipeline_mode<synchronous>, transform_indices = @transform_1, window_bounds = array<i64: 5, 784, 256>}, {pipeline_mode = #tpu.pipeline_mode<synchronous>, transform_indices = @transform_2, window_bounds = array<i64: 5, 1, 256>}, {pipeline_mode = #tpu.pipeline_mode<synchronous>, transform_indices = @transform_3, window_bounds = array<i64: 256, 640>}, {pipeline_mode = #tpu.pipeline_mode<synchronous>, transform_indices = @transform_4, window_bounds = array<i64: 1, 640>}, {pipeline_mode = #tpu.pipeline_mode<synchronous>, transform_indices = @transform_5, window_bounds = array<i64: 1, 128>}, {pipeline_mode = #tpu.pipeline_mode<synchronous>, transform_indices = @transform_6, window_bounds = array<i64: 1, 1>}, {transform_indices = @transform_7, window_bounds = array<i64: 8, 1>}]} {
    %c0 = arith.constant 0 : index
    %c0_0 = arith.constant 0 : index
    %0 = vector.load %arg1[%c0, %c0_0] : memref<8x784xf32, #tpu.memory_space<vmem>>, vector<8x784xf32>
    %1 = arith.truncf %0 : vector<8x784xf32> to vector<8x784xbf16>
    %c0_1 = arith.constant 0 : index
    %c0_2 = arith.constant 0 : index
    %c0_3 = arith.constant 0 : index
    %2 = vector.load %arg2[%c0_1, %c0_2, %c0_3] : memref<5x784x256xbf16, #tpu.memory_space<vmem>>, vector<1x784x256xbf16>
    %3 = vector.shape_cast %2 : vector<1x784x256xbf16> to vector<784x256xbf16>
    %cst = arith.constant dense<0.000000e+00> : vector<8x256xf32>
    %4 = tpu.matmul %1, %3, %cst {dimension_numbers = #tpu.dot_dimension_numbers<[1], [0], [0], [1], [0, 0, 1, 1], [], []>} : vector<8x784xbf16>, vector<784x256xbf16>, vector<8x256xf32> -> vector<8x256xf32>
    %c0_4 = arith.constant 0 : index
    %c0_5 = arith.constant 0 : index
    %c0_6 = arith.constant 0 : index
    %5 = vector.load %arg3[%c0_4, %c0_5, %c0_6] : memref<5x1x256xf32, #tpu.memory_space<vmem>>, vector<1x1x256xf32>
    %6 = vector.shape_cast %5 : vector<1x1x256xf32> to vector<1x256xf32>
    %7 = vector.broadcast %6 : vector<1x256xf32> to vector<8x256xf32>
    %8 = arith.addf %4, %7 : vector<8x256xf32>
    %c1 = arith.constant 1 : index
    %c0_7 = arith.constant 0 : index
    %c0_8 = arith.constant 0 : index
    %9 = vector.load %arg2[%c1, %c0_7, %c0_8] : memref<5x784x256xbf16, #tpu.memory_space<vmem>>, vector<1x784x256xbf16>
    %10 = vector.shape_cast %9 : vector<1x784x256xbf16> to vector<784x256xbf16>
    %cst_9 = arith.constant dense<0.000000e+00> : vector<8x256xf32>
    %11 = tpu.matmul %1, %10, %cst_9 {dimension_numbers = #tpu.dot_dimension_numbers<[1], [0], [0], [1], [0, 0, 1, 1], [], []>} : vector<8x784xbf16>, vector<784x256xbf16>, vector<8x256xf32> -> vector<8x256xf32>
    %c1_10 = arith.constant 1 : index
    %c0_11 = arith.constant 0 : index
    %c0_12 = arith.constant 0 : index
    %12 = vector.load %arg3[%c1_10, %c0_11, %c0_12] : memref<5x1x256xf32, #tpu.memory_space<vmem>>, vector<1x1x256xf32>
    %13 = vector.shape_cast %12 : vector<1x1x256xf32> to vector<1x256xf32>
    %14 = vector.broadcast %13 : vector<1x256xf32> to vector<8x256xf32>
    %15 = arith.addf %11, %14 : vector<8x256xf32>
    %16 = arith.maximumf %8, %15 : vector<8x256xf32>
    %c2 = arith.constant 2 : index
    %c0_13 = arith.constant 0 : index
    %c0_14 = arith.constant 0 : index
    %17 = vector.load %arg2[%c2, %c0_13, %c0_14] : memref<5x784x256xbf16, #tpu.memory_space<vmem>>, vector<1x784x256xbf16>
    %18 = vector.shape_cast %17 : vector<1x784x256xbf16> to vector<784x256xbf16>
    %cst_15 = arith.constant dense<0.000000e+00> : vector<8x256xf32>
    %19 = tpu.matmul %1, %18, %cst_15 {dimension_numbers = #tpu.dot_dimension_numbers<[1], [0], [0], [1], [0, 0, 1, 1], [], []>} : vector<8x784xbf16>, vector<784x256xbf16>, vector<8x256xf32> -> vector<8x256xf32>
    %c2_16 = arith.constant 2 : index
    %c0_17 = arith.constant 0 : index
    %c0_18 = arith.constant 0 : index
    %20 = vector.load %arg3[%c2_16, %c0_17, %c0_18] : memref<5x1x256xf32, #tpu.memory_space<vmem>>, vector<1x1x256xf32>
    %21 = vector.shape_cast %20 : vector<1x1x256xf32> to vector<1x256xf32>
    %22 = vector.broadcast %21 : vector<1x256xf32> to vector<8x256xf32>
    %23 = arith.addf %19, %22 : vector<8x256xf32>
    %24 = arith.maximumf %16, %23 : vector<8x256xf32>
    %c3 = arith.constant 3 : index
    %c0_19 = arith.constant 0 : index
    %c0_20 = arith.constant 0 : index
    %25 = vector.load %arg2[%c3, %c0_19, %c0_20] : memref<5x784x256xbf16, #tpu.memory_space<vmem>>, vector<1x784x256xbf16>
    %26 = vector.shape_cast %25 : vector<1x784x256xbf16> to vector<784x256xbf16>
    %cst_21 = arith.constant dense<0.000000e+00> : vector<8x256xf32>
    %27 = tpu.matmul %1, %26, %cst_21 {dimension_numbers = #tpu.dot_dimension_numbers<[1], [0], [0], [1], [0, 0, 1, 1], [], []>} : vector<8x784xbf16>, vector<784x256xbf16>, vector<8x256xf32> -> vector<8x256xf32>
    %c3_22 = arith.constant 3 : index
    %c0_23 = arith.constant 0 : index
    %c0_24 = arith.constant 0 : index
    %28 = vector.load %arg3[%c3_22, %c0_23, %c0_24] : memref<5x1x256xf32, #tpu.memory_space<vmem>>, vector<1x1x256xf32>
    %29 = vector.shape_cast %28 : vector<1x1x256xf32> to vector<1x256xf32>
    %30 = vector.broadcast %29 : vector<1x256xf32> to vector<8x256xf32>
    %31 = arith.addf %27, %30 : vector<8x256xf32>
    %32 = arith.maximumf %24, %31 : vector<8x256xf32>
    %c4 = arith.constant 4 : index
    %c0_25 = arith.constant 0 : index
    %c0_26 = arith.constant 0 : index
    %33 = vector.load %arg2[%c4, %c0_25, %c0_26] : memref<5x784x256xbf16, #tpu.memory_space<vmem>>, vector<1x784x256xbf16>
    %34 = vector.shape_cast %33 : vector<1x784x256xbf16> to vector<784x256xbf16>
    %cst_27 = arith.constant dense<0.000000e+00> : vector<8x256xf32>
    %35 = tpu.matmul %1, %34, %cst_27 {dimension_numbers = #tpu.dot_dimension_numbers<[1], [0], [0], [1], [0, 0, 1, 1], [], []>} : vector<8x784xbf16>, vector<784x256xbf16>, vector<8x256xf32> -> vector<8x256xf32>
    %c4_28 = arith.constant 4 : index
    %c0_29 = arith.constant 0 : index
    %c0_30 = arith.constant 0 : index
    %36 = vector.load %arg3[%c4_28, %c0_29, %c0_30] : memref<5x1x256xf32, #tpu.memory_space<vmem>>, vector<1x1x256xf32>
    %37 = vector.shape_cast %36 : vector<1x1x256xf32> to vector<1x256xf32>
    %38 = vector.broadcast %37 : vector<1x256xf32> to vector<8x256xf32>
    %39 = arith.addf %35, %38 : vector<8x256xf32>
    %40 = arith.maximumf %32, %39 : vector<8x256xf32>
    %41 = arith.truncf %40 : vector<8x256xf32> to vector<8x256xbf16>
    %c0_31 = arith.constant 0 : index
    %c0_32 = arith.constant 0 : index
    %42 = vector.load %arg4[%c0_31, %c0_32] : memref<256x640xbf16, #tpu.memory_space<vmem>>, vector<256x640xbf16>
    %cst_33 = arith.constant dense<0.000000e+00> : vector<8x640xf32>
    %43 = tpu.matmul %41, %42, %cst_33 {dimension_numbers = #tpu.dot_dimension_numbers<[1], [0], [0], [1], [0, 0, 1, 1], [], []>} : vector<8x256xbf16>, vector<256x640xbf16>, vector<8x640xf32> -> vector<8x640xf32>
    %c0_34 = arith.constant 0 : index
    %c0_35 = arith.constant 0 : index
    %44 = vector.load %arg5[%c0_34, %c0_35] : memref<1x640xf32, #tpu.memory_space<vmem>>, vector<1x640xf32>
    %45 = vector.broadcast %44 : vector<1x640xf32> to vector<8x640xf32>
    %46 = arith.addf %43, %45 : vector<8x640xf32>
    %47 = vector.extract_strided_slice %46 {offsets = [0, 0], sizes = [8, 128], strides = [1, 1]} : vector<8x640xf32> to vector<8x128xf32>
    %48 = vector.extract_strided_slice %46 {offsets = [0, 128], sizes = [8, 128], strides = [1, 1]} : vector<8x640xf32> to vector<8x128xf32>
    %49 = arith.maximumf %47, %48 : vector<8x128xf32>
    %50 = vector.extract_strided_slice %46 {offsets = [0, 256], sizes = [8, 128], strides = [1, 1]} : vector<8x640xf32> to vector<8x128xf32>
    %51 = arith.maximumf %49, %50 : vector<8x128xf32>
    %52 = vector.extract_strided_slice %46 {offsets = [0, 384], sizes = [8, 128], strides = [1, 1]} : vector<8x640xf32> to vector<8x128xf32>
    %53 = arith.maximumf %51, %52 : vector<8x128xf32>
    %54 = vector.extract_strided_slice %46 {offsets = [0, 512], sizes = [8, 128], strides = [1, 1]} : vector<8x640xf32> to vector<8x128xf32>
    %55 = arith.maximumf %53, %54 : vector<8x128xf32>
    %c0_36 = arith.constant 0 : index
    %c0_37 = arith.constant 0 : index
    %56 = vector.load %arg6[%c0_36, %c0_37] : memref<1x128xf32, #tpu.memory_space<vmem>>, vector<1x128xf32>
    %57 = vector.broadcast %56 : vector<1x128xf32> to vector<8x128xf32>
    %58 = arith.mulf %55, %57 : vector<8x128xf32>
    %cst_38 = arith.constant dense<0.000000e+00> : vector<8xf32>
    %59 = vector.multi_reduction <add>, %58, %cst_38 [1] : vector<8x128xf32> to vector<8xf32>
    %60 = vector.shape_cast %59 : vector<8xf32> to vector<8x1xf32>
    %c0_39 = arith.constant 0 : index
    %c0_40 = arith.constant 0 : index
    %61 = vector.load %arg7[%c0_39, %c0_40] : memref<1x1xf32, #tpu.memory_space<vmem>>, vector<1x1xf32>
    %62 = vector.broadcast %61 : vector<1x1xf32> to vector<8x1xf32>
    %63 = arith.addf %60, %62 : vector<8x1xf32>
    %64 = arith.negf %63 : vector<8x1xf32>
    %65 = math.exp %64 : vector<8x1xf32>
    %cst_41 = arith.constant 1.000000e+00 : f32
    %66 = vector.broadcast %cst_41 : f32 to vector<8x1xf32>
    %67 = arith.addf %66, %65 : vector<8x1xf32>
    %68 = arith.divf %66, %67 : vector<8x1xf32>
    %c0_42 = arith.constant 0 : index
    %c0_43 = arith.constant 0 : index
    %69 = vector.load %arg8[%c0_42, %c0_43] : memref<8x1xf32, #tpu.memory_space<vmem>>, vector<8x1xf32>
    tpu.vector_store %arg8[%c0_42, %c0_43], %68 {strides = array<i32>} : memref<8x1xf32, #tpu.memory_space<vmem>>, vector<8x1xf32>,
    return
  }
  func.func @transform_0(%arg0: i32) -> (i32, i32) {
    %c0_i32 = arith.constant 0 : i32
    %c0_i32_0 = arith.constant 0 : i32
    return %arg0, %c0_i32 : i32, i32
  }
  func.func @transform_1(%arg0: i32) -> (i32, i32, i32) {
    %c0_i32 = arith.constant 0 : i32
    %c0_i32_0 = arith.constant 0 : i32
    %c0_i32_1 = arith.constant 0 : i32
    %c0_i32_2 = arith.constant 0 : i32
    return %c0_i32, %c0_i32_0, %c0_i32_1 : i32, i32, i32
  }
  func.func @transform_2(%arg0: i32) -> (i32, i32, i32) {
    %c0_i32 = arith.constant 0 : i32
    %c0_i32_0 = arith.constant 0 : i32
    %c0_i32_1 = arith.constant 0 : i32
    %c0_i32_2 = arith.constant 0 : i32
    return %c0_i32, %c0_i32_0, %c0_i32_1 : i32, i32, i32
  }
  func.func @transform_3(%arg0: i32) -> (i32, i32) {
    %c0_i32 = arith.constant 0 : i32
    %c0_i32_0 = arith.constant 0 : i32
    %c0_i32_1 = arith.constant 0 : i32
    return %c0_i32, %c0_i32_0 : i32, i32
  }
  func.func @transform_4(%arg0: i32) -> (i32, i32) {
    %c0_i32 = arith.constant 0 : i32
    %c0_i32_0 = arith.constant 0 : i32
    %c0_i32_1 = arith.constant 0 : i32
    return %c0_i32, %c0_i32_0 : i32, i32
  }
  func.func @transform_5(%arg0: i32) -> (i32, i32) {
    %c0_i32 = arith.constant 0 : i32
    %c0_i32_0 = arith.constant 0 : i32
    %c0_i32_1 = arith.constant 0 : i32
    return %c0_i32, %c0_i32_0 : i32, i32
  }
  func.func @transform_6(%arg0: i32) -> (i32, i32) {
    %c0_i32 = arith.constant 0 : i32
    %c0_i32_0 = arith.constant 0 : i32
    %c0_i32_1 = arith.constant 0 : i32
    return %c0_i32, %c0_i32_0 : i32, i32
  }
  func.func @transform_7(%arg0: i32) -> (i32, i32) {
    %c0_i32 = arith.constant 0 : i32
    %c0_i32_0 = arith.constant 0 : i32
    return %arg0, %c0_i32 : i32, i32
  }
}

</mosaic_0001>

<bundles_post_ra>
// kernel: tpu_custom_call.1
= control target key start
LH: loop header
LB: loop body
LE: loop exit
PB: predicated region body
PF: predicated region fallthrough
CT: control target
= control target key end

     0   :  { %s6588_s0 = inlined_call_operand.hbm [shape: f32[8,784], index: 0, kind: input, shape index: {}]   ;;  %s6589_s1 = inlined_call_operand.hbm [shape: bf16[5,784,256], index: 1, kind: input, shape index: {}]   ;;  %s6590_s2 = inlined_call_operand.hbm [shape: f32[5,1,256], index: 2, kind: input, shape index: {}]   ;;  %s6591_s3 = inlined_call_operand.hbm [shape: bf16[256,640], index: 3, kind: input, shape index: {}]   ;;  %s6592_s4 = inlined_call_operand.hbm [shape: f32[1,640], index: 4, kind: input, shape index: {}]   ;;  %s6593_s5 = inlined_call_operand.hbm [shape: f32[1,128], index: 5, kind: input, shape index: {}]   ;;  %s6594_s6 = inlined_call_operand.<no memory space> [shape: f32[1,1], index: 6, kind: input, shape index: {}]   ;;  %s6595_s7 = inlined_call_operand.vmem [shape: f32[8,1], index: 7, kind: output, shape index: {}]  }
   0x1   :  { %v12_v0 = vstv %s6594_s6 }
   0x2   :  { %13 = vst [vmem:[#allocation2] sm:$0x1] %v12_v0 }
   0x3   :  { %14 = vsyncpa [#allocation4], 0 }
   0x4   :  { %15 = vsyncpa [#allocation6], 0 }
   0x5   :  { %16 = vsyncpa [#allocation9], 0 }
   0x6   :  { %17 = vsyncpa [#allocation12], 0  ;;  %s6328_s26 = smov [#allocation5]   ;;  %s6188_s30 = scalar_lea.hbm %s6589_s1, 62720 }
   0x7   :  { %s33_s27 = sshll.u32 %s6328_s26, 4  ;;  %p6189_p0 = scmp.ne.s32.totalorder %s6589_s1, %s6188_s30  ;;  %s34_s27 = int_to_ptr.vmem [resolvable:$true] %s33_s27 }
   0x8   :  { %p6192_p1 = scmp.lt.u32.totalorder %s6188_s30, %s6589_s1 }
   0xa   :  { %p6194_p2 = pnand %p6192_p1, %p6189_p0 }
   0xc   :  { %6197 = shalt.err (!%p6194_p2)
}
   0xd   :  { %s6198_s6 = scalar_lea.vmem %s34_s27, 62720  ;;  %p6203_p4 = scmp.lt.s32.totalorder %s34_s27, %s34_s27 }
   0xe   :  { %p6199_p3 = scmp.ne.s32.totalorder %s34_s27, %s6198_s6  ;;  %p6204_p5 = scmp.lt.s32.totalorder %s6198_s6, %s6198_s6 }
  0x10   :  { %p6205_p6 = por %p6204_p5, %p6203_p4 }
  0x12   :  { %p6206_p7 = pnand %p6205_p6, %p6199_p3 }
  0x14   :  { %6209 = shalt.err (!%p6206_p7)
}
  0x15   :  { %s6329_s12 = smov 128   ;;  %s6330_s13 = smov 8  }
  0x16   :  { %39 = dma.hbm_to_vmem [thread:$0]  %s6589_s1, 62720, %s34_s27, [#allocation6], %s6329_s12, %s6329_s12, %s6330_s13  }
  0x17   :  { %s6331_s16 = smov [#allocation8]   ;;  %s6210_s20 = scalar_lea.hbm %s6591_s3, 10240 }
  0x18   :  { %s57_s17 = sshll.u32 %s6331_s16, 4  ;;  %p6211_p8 = scmp.ne.s32.totalorder %s6591_s3, %s6210_s20  ;;  %s58_s17 = int_to_ptr.vmem [resolvable:$true] %s57_s17 }
  0x19   :  { %p6214_p9 = scmp.lt.u32.totalorder %s6210_s20, %s6591_s3 }
  0x1b   :  { %p6216_p10 = pnand %p6214_p9, %p6211_p8 }
  0x1d   :  { %6219 = shalt.err (!%p6216_p10)
}
  0x1e   :  { %s6220_s25 = scalar_lea.vmem %s58_s17, 10240  ;;  %p6225_p12 = scmp.lt.s32.totalorder %s58_s17, %s58_s17 }
  0x1f   :  { %p6221_p11 = scmp.ne.s32.totalorder %s58_s17, %s6220_s25  ;;  %p6226_p13 = scmp.lt.s32.totalorder %s6220_s25, %s6220_s25 }
  0x21   :  { %p6227_p0 = por %p6226_p13, %p6225_p12 }
  0x23   :  { %p6228_p1 = pnand %p6227_p0, %p6221_p11 }
  0x25   :  { %6231 = shalt.err (!%p6228_p1)
}
  0x26   :  { %s6332_s1 = smov 320   ;;  %s6333_s26 = smov 20  }
  0x27   :  { %63 = dma.hbm_to_vmem [thread:$0]  %s6591_s3, 10240, %s58_s17, [#allocation9], %s6332_s1, %s6332_s1, %s6333_s26  }
  0x28   :  { %s6334_s29 = smov [#allocation3]   ;;  %s6335_s8 = smov [#allocation7]  }
  0x29   :  { %s24_s30 = sshll.u32 %s6334_s29, 4  ;;  %s45_s9 = sshll.u32 %s6335_s8, 4  ;;  %s25_s30 = int_to_ptr.vmem [resolvable:$true] %s24_s30  ;;  %s6408_s9 = int_to_ptr.vmem [resolvable:$true] %s45_s9 }
  0x2a   :  { %s6232_s6 = scalar_lea.hbm %s6588_s0, 896 }
  0x2b   :  { %p6233_p2 = scmp.ne.s32.totalorder %s6588_s0, %s6232_s6  ;;  %p6236_p3 = scmp.lt.u32.totalorder %s6232_s6, %s6588_s0 }
  0x2d   :  { %p6238_p4 = pnand %p6236_p3, %p6233_p2 }
  0x2f   :  { %6241 = shalt.err (!%p6238_p4)
}
  0x30   :  { %s6242_s3 = scalar_lea.vmem %s25_s30, 896  ;;  %p6247_p6 = scmp.lt.s32.totalorder %s25_s30, %s25_s30 }
  0x31   :  { %p6243_p5 = scmp.ne.s32.totalorder %s25_s30, %s6242_s3  ;;  %p6248_p7 = scmp.lt.s32.totalorder %s6242_s3, %s6242_s3 }
  0x33   :  { %p6249_p8 = por %p6248_p7, %p6247_p6 }
  0x35   :  { %p6250_p9 = pnand %p6249_p8, %p6243_p5 }
  0x37   :  { %6253 = shalt.err (!%p6250_p9)
}
  0x38   :  { %27 = dma.hbm_to_vmem [thread:$0]  %s6588_s0, 896, %s25_s30, [#allocation4]  }
  0x39   :  { %s6254_s20 = scalar_lea.hbm %s6590_s2, 160 }
  0x3a   :  { %p6255_p10 = scmp.ne.s32.totalorder %s6590_s2, %s6254_s20  ;;  %p6258_p11 = scmp.lt.u32.totalorder %s6254_s20, %s6590_s2 }
  0x3c   :  { %p6260_p12 = pnand %p6258_p11, %p6255_p10 }
  0x3e   :  { %6263 = shalt.err (!%p6260_p12)
}
  0x3f   :  { %s6264_s25 = scalar_lea.vmem %s6408_s9, 160  ;;  %p6269_p0 = scmp.lt.s32.totalorder %s6408_s9, %s6408_s9 }
  0x40   :  { %p6265_p13 = scmp.ne.s32.totalorder %s6408_s9, %s6264_s25  ;;  %p6270_p1 = scmp.lt.s32.totalorder %s6264_s25, %s6264_s25 }
  0x42   :  { %p6271_p2 = por %p6270_p1, %p6269_p0 }
  0x44   :  { %p6272_p3 = pnand %p6271_p2, %p6265_p13 }
  0x46   :  { %6275 = shalt.err (!%p6272_p3)
}
  0x47   :  { %s6336_s0 = smov 32   ;;  %s6337_s1 = smov 2  }
  0x48   :  { %51 = dma.hbm_to_vmem [thread:$0]  %s6590_s2, 160, %s6408_s9, [#allocation6], %s6336_s0, %s6336_s0, %s6337_s1  }
  0x49   :  { %s6338_s28 = smov [#allocation10]   ;;  %s6339_s30 = smov [#allocation11]  }
  0x4a   :  { %s70_s29 = sshll.u32 %s6338_s28, 4  ;;  %s80_s8 = sshll.u32 %s6339_s30, 4  ;;  %s71_s29 = int_to_ptr.vmem [resolvable:$true] %s70_s29  ;;  %s81_s8 = int_to_ptr.vmem [resolvable:$true] %s80_s8 }
  0x4b   :  { %s6276_s6 = scalar_lea.hbm %s6592_s4, 80 }
  0x4c   :  { %p6277_p4 = scmp.ne.s32.totalorder %s6592_s4, %s6276_s6  ;;  %p6280_p5 = scmp.lt.u32.totalorder %s6276_s6, %s6592_s4 }
  0x4e   :  { %p6282_p6 = pnand %p6280_p5, %p6277_p4 }
  0x50   :  { %6285 = shalt.err (!%p6282_p6)
}
  0x51   :  { %s6286_s2 = scalar_lea.vmem %s71_s29, 80  ;;  %s6290_s9 = scalar_lea.vmem %s71_s29, 96 }
  0x52   :  { %p6287_p7 = scmp.ne.s32.totalorder %s71_s29, %s6286_s2  ;;  %p6291_p8 = scmp.lt.s32.totalorder %s71_s29, %s71_s29 }
  0x53   :  { %p6292_p9 = scmp.lt.s32.totalorder %s6290_s9, %s6286_s2 }
  0x55   :  { %p6293_p10 = por %p6292_p9, %p6291_p8 }
  0x57   :  { %p6294_p11 = pnand %p6293_p10, %p6287_p7 }
  0x59   :  { %6297 = shalt.err (!%p6294_p11)
}
  0x5a   :  { %73 = dma.hbm_to_vmem [thread:$0]  %s6592_s4, 80, %s71_s29, [#allocation9]  }
  0x5b   :  { %s6298_s19 = scalar_lea.hbm %s6593_s5, 16 }
  0x5c   :  { %p6299_p12 = scmp.ne.s32.totalorder %s6593_s5, %s6298_s19  ;;  %p6302_p13 = scmp.lt.u32.totalorder %s6298_s19, %s6593_s5 }
  0x5e   :  { %p6304_p0 = pnand %p6302_p13, %p6299_p12 }
  0x60   :  { %6307 = shalt.err (!%p6304_p0)
}
  0x61   :  { %s6308_s24 = scalar_lea.vmem %s81_s8, 16  ;;  %s6312_s25 = scalar_lea.vmem %s81_s8, 32 }
  0x62   :  { %p6309_p1 = scmp.ne.s32.totalorder %s81_s8, %s6308_s24  ;;  %p6313_p2 = scmp.lt.s32.totalorder %s81_s8, %s81_s8 }
  0x63   :  { %p6314_p3 = scmp.lt.s32.totalorder %s6312_s25, %s6308_s24 }
  0x65   :  { %p6315_p4 = por %p6314_p3, %p6313_p2 }
  0x67   :  { %p6316_p5 = pnand %p6315_p4, %p6309_p1 }
  0x69   :  { %6319 = shalt.err (!%p6316_p5)
}
  0x6a   :  { %83 = dma.hbm_to_vmem [thread:$0]  %s6593_s5, 16, %s81_s8, [#allocation12]  }
  0x6b   :  { %6320 = dma.done.wait [#allocation4], 896  }
  0x6c   :  { %6321 = vsyncadd [#allocation4], 4294966400 }
  0x6d   :  { %6322 = dma.done.wait [#allocation6], 62880  }
  0x6e   :  { %6323 = vsyncadd [#allocation6], 4294904416 }
  0x6f   :  { %6324 = dma.done.wait [#allocation9], 10320  }
  0x70   :  { %6325 = vsyncadd [#allocation9], 4294956976 }
  0x71   :  { %6326 = dma.done.wait [#allocation12], 16  }
  0x72   :  { %6327 = vsyncadd [#allocation12], 4294967280  ;;  %v6340_v1 = vmov 0   ;;  %v5337_v2 = vld [vmem:[#allocation5 + $0x4] ss:$8 sps:$4 sm:$0xff]   ;;  %v111_v10 = vld [vmem:[#allocation3 + $0x30] sm:$0xff] }
  0x73   :  { %878 = vmatprep.mubr.bf16.mxu1 %v6340_v1  ;;  %v5339_v3 = vld [vmem:[#allocation5 + $0x304] ss:$8 sps:$4 sm:$0xff]   ;;  %723 = vmatprep.subr.bf16.mxu0 %v5337_v2  ;;  %v5341_v4 = vld [vmem:[#allocation5] ss:$8 sps:$4 sm:$0xff]   ;;  %v5343_v6 = vld [vmem:[#allocation5 + $0x14] ss:$8 sps:$4 sm:$0xff]   ;;  %v6464_v11 = vpack.c.bf16 %v111_v10, %v111_v10 }
  0x74   :  { %v5342_v5 = vld [vmem:[#allocation5 + $0x300] ss:$8 sps:$4 sm:$0xff]   ;;  %846 = vmatprep.subr.bf16.mxu1 %v5339_v3  ;;  %724 = vmatpush1.bf16.msra.mxu0 %v5341_v4  ;;  %v5345_v7 = vld [vmem:[#allocation5 + $0x310] ss:$8 sps:$4 sm:$0xff]   ;;  %v5347_v8 = vld [vmem:[#allocation5 + $0x314] ss:$8 sps:$4 sm:$0xff]  }
  0x75   :  { %847 = vmatpush1.bf16.msra.mxu1 %v5342_v5  ;;  %725 = vmatprep.subr.bf16.mxu0 %v5343_v6  ;;  %v5348_v9 = vld [vmem:[#allocation5 + $0x10] ss:$8 sps:$4 sm:$0xff]   ;;  %vm719_vm0 = vcmask 130048   ;;  %v5349_v12 = vld [vmem:[#allocation5 + $0x24] ss:$8 sps:$4 sm:$0xff]   ;;  %vm4650_vm1 = vcmask 7168  }
  0x76   :  { %1489 = vmatprep.subr.bf16.mxu1 %v5347_v8  ;;  %v5351_v13 = vld [vmem:[#allocation5 + $0x320] ss:$8 sps:$4 sm:$0xff]   ;;  %v5353_v14 = vld [vmem:[#allocation5 + $0x324] ss:$8 sps:$4 sm:$0xff]   ;;  %v5355_v16 = vld [vmem:[#allocation5 + $0x34] ss:$8 sps:$4 sm:$0xff]  }
  0x77   :  { %v5354_v15 = vld [vmem:[#allocation5 + $0x20] ss:$8 sps:$4 sm:$0xff]   ;;  %v5359_v17 = vld [vmem:[#allocation5 + $0x334] ss:$8 sps:$4 sm:$0xff]   ;;  %v5360_v18 = vld [vmem:[#allocation5 + $0x30] ss:$8 sps:$4 sm:$0xff]  }
  0x78   :  { %726 = vmatpush1.bf16.msra.mxu0 %v5348_v9  ;;  %4758 = vmatmul.mubr.msk.bf16.vlgmr.msra.gmra.mrb[0].mxu1 %vm719_vm0, %v6464_v11  ;;  %v5357_v19 = vld [vmem:[#allocation5 + $0x330] ss:$8 sps:$4 sm:$0xff]   ;;  %v5361_v20 = vld [vmem:[#allocation5 + $0x44] ss:$8 sps:$4 sm:$0xff]   ;;  %v5363_v22 = vld [vmem:[#allocation5 + $0x340] ss:$8 sps:$4 sm:$0xff]  }
  0x79   :  { %1490 = vmatpush1.bf16.msra.mxu1 %v5345_v7  ;;  %727 = vmatprep.subr.bf16.mxu0 %v5349_v12  ;;  %v5365_v21 = vld [vmem:[#allocation5 + $0x344] ss:$8 sps:$4 sm:$0xff]   ;;  %v5366_v23 = vld [vmem:[#allocation5 + $0x40] ss:$8 sps:$4 sm:$0xff]   ;;  %v5367_v24 = vld [vmem:[#allocation5 + $0x54] ss:$8 sps:$4 sm:$0xff]  }
  0x7a   :  { %1491 = vmatprep.subr.bf16.mxu1 %v5353_v14  ;;  %v5371_v25 = vld [vmem:[#allocation5 + $0x354] ss:$8 sps:$4 sm:$0xff]   ;;  %v5372_v26 = vld [vmem:[#allocation5 + $0x50] ss:$8 sps:$4 sm:$0xff]   ;;  %v5373_v28 = vld [vmem:[#allocation5 + $0x64] ss:$8 sps:$4 sm:$0xff]  }
  0x7b   :  { %v5369_v27 = vld [vmem:[#allocation5 + $0x350] ss:$8 sps:$4 sm:$0xff]   ;;  %v5377_v29 = vld [vmem:[#allocation5 + $0x364] ss:$8 sps:$4 sm:$0xff]   ;;  %v5375_v30 = vld [vmem:[#allocation5 + $0x360] ss:$8 sps:$4 sm:$0xff]  }
  0x7c   :  { %728 = vmatpush1.bf16.msra.mxu0 %v5354_v15  ;;  %v5378_v31 = vld [vmem:[#allocation5 + $0x60] ss:$8 sps:$4 sm:$0xff]   ;;  %v5379_v32 = vld [vmem:[#allocation5 + $0x74] ss:$8 sps:$4 sm:$0xff]   ;;  %v5384_v34 = vld [vmem:[#allocation5 + $0x70] ss:$8 sps:$4 sm:$0xff]  }
  0x7d   :  { %1492 = vmatpush1.bf16.msra.mxu1 %v5351_v13  ;;  %729 = vmatprep.subr.bf16.mxu0 %v5355_v16  ;;  %v5383_v33 = vld [vmem:[#allocation5 + $0x374] ss:$8 sps:$4 sm:$0xff]   ;;  %v5381_v35 = vld [vmem:[#allocation5 + $0x370] ss:$8 sps:$4 sm:$0xff]   ;;  %v5385_v36 = vld [vmem:[#allocation5 + $0x84] ss:$8 sps:$4 sm:$0xff]  }
  0x7e   :  { %1493 = vmatprep.subr.bf16.mxu1 %v5359_v17  ;;  %v5389_v37 = vld [vmem:[#allocation5 + $0x384] ss:$8 sps:$4 sm:$0xff]   ;;  %v5387_v38 = vld [vmem:[#allocation5 + $0x380] ss:$8 sps:$4 sm:$0xff]   ;;  %v5391_v40 = vld [vmem:[#allocation5 + $0x94] ss:$8 sps:$4 sm:$0xff]  }
  0x7f   :  { %v5390_v39 = vld [vmem:[#allocation5 + $0x80] ss:$8 sps:$4 sm:$0xff]   ;;  %v5395_v41 = vld [vmem:[#allocation5 + $0x394] ss:$8 sps:$4 sm:$0xff]   ;;  %v5396_v42 = vld [vmem:[#allocation5 + $0x90] ss:$8 sps:$4 sm:$0xff]  }
  0x80   :  { %730 = vmatpush1.bf16.msra.mxu0 %v5360_v18  ;;  %v5393_v43 = vld [vmem:[#allocation5 + $0x390] ss:$8 sps:$4 sm:$0xff]   ;;  %v5397_v44 = vld [vmem:[#allocation5 + $0xa4] ss:$8 sps:$4 sm:$0xff]   ;;  %v5399_v46 = vld [vmem:[#allocation5 + $0x3a0] ss:$8 sps:$4 sm:$0xff]  }
  0x81   :  { %1494 = vmatpush1.bf16.msra.mxu1 %v5357_v19  ;;  %731 = vmatprep.subr.bf16.mxu0 %v5361_v20  ;;  %v5401_v45 = vld [vmem:[#allocation5 + $0x3a4] ss:$8 sps:$4 sm:$0xff]   ;;  %v5402_v47 = vld [vmem:[#allocation5 + $0xa0] ss:$8 sps:$4 sm:$0xff]   ;;  %v5403_v48 = vld [vmem:[#allocation5 + $0xb4] ss:$8 sps:$4 sm:$0xff]  }
  0x82   :  { %1495 = vmatprep.subr.bf16.mxu1 %v5365_v21  ;;  %v5407_v49 = vld [vmem:[#allocation5 + $0x3b4] ss:$8 sps:$4 sm:$0xff]   ;;  %v5408_v51 = vld [vmem:[#allocation5 + $0xb0] ss:$8 sps:$4 sm:$0xff]   ;;  %v5409_v54 = vld [vmem:[#allocation5 + $0xc4] ss:$8 sps:$4 sm:$0xff]  }
  0x83   :  { %v106_v50 = vld [vmem:[#allocation3 + $0x8] sm:$0xff]  ;;  %v5413_v55 = vld [vmem:[#allocation5 + $0x3c4] ss:$8 sps:$4 sm:$0xff]   ;;  %v5411_v56 = vld [vmem:[#allocation5 + $0x3c0] ss:$8 sps:$4 sm:$0xff]  }
  0x84   :  { %732 = vmatpush1.bf16.msra.mxu0 %v5366_v23  ;;  %v6468_v52 = vpack.c.bf16 %v106_v50, %v106_v50  ;;  %v5405_v53 = vld [vmem:[#allocation5 + $0x3b0] ss:$8 sps:$4 sm:$0xff]   ;;  %v5414_v57 = vld [vmem:[#allocation5 + $0xc0] ss:$8 sps:$4 sm:$0xff]   ;;  %v5415_v58 = vld [vmem:[#allocation5 + $0xd4] ss:$8 sps:$4 sm:$0xff]  }
  0x85   :  { %1496 = vmatpush1.bf16.msra.mxu1 %v5363_v22  ;;  %733 = vmatprep.subr.bf16.mxu0 %v5367_v24  ;;  %v5419_v59 = vld [vmem:[#allocation5 + $0x3d4] ss:$8 sps:$4 sm:$0xff]   ;;  %v5417_v60 = vld [vmem:[#allocation5 + $0x3d0] ss:$8 sps:$4 sm:$0xff]   ;;  %v5421_v62 = vld [vmem:[#allocation5 + $0xe4] ss:$8 sps:$4 sm:$0xff]  }
  0x86   :  { %1497 = vmatprep.subr.bf16.mxu1 %v5371_v25  ;;  %755 = vmatprep.mubr.bf16.mxu0 %v6468_v52  ;;  %v5420_v61 = vld [vmem:[#allocation5 + $0xd0] ss:$8 sps:$4 sm:$0xff]   ;;  %v5425_v63 = vld [vmem:[#allocation5 + $0x3e4] ss:$8 sps:$4 sm:$0xff]   ;;  %v5423_v0 = vld [vmem:[#allocation5 + $0x3e0] ss:$8 sps:$4 sm:$0xff]  }
  0x87   :  { %1521 = vmatprep.mubr.bf16.mxu1 %v6468_v52  ;;  %v5426_v2 = vld [vmem:[#allocation5 + $0xe0] ss:$8 sps:$4 sm:$0xff]   ;;  %v5427_v3 = vld [vmem:[#allocation5 + $0xf4] ss:$8 sps:$4 sm:$0xff]   ;;  %v5429_v5 = vld [vmem:[#allocation5 + $0x3f0] ss:$8 sps:$4 sm:$0xff]  }
  0x88   :  { %734 = vmatpush1.bf16.msra.mxu0 %v5372_v26  ;;  %v5431_v4 = vld [vmem:[#allocation5 + $0x3f4] ss:$8 sps:$4 sm:$0xff]   ;;  %v5432_v6 = vld [vmem:[#allocation5 + $0xf0] ss:$8 sps:$4 sm:$0xff]   ;;  %v105_v7 = vld [vmem:[#allocation3] sm:$0xff] }
  0x89   :  { %1498 = vmatpush1.bf16.msra.mxu1 %v5369_v27  ;;  %735 = vmatprep.subr.bf16.mxu0 %v5373_v28  ;;  %v5435_v8 = vld [vmem:[#allocation5 + $0x104] ss:$8 sps:$4 sm:$0xff]   ;;  %v6472_v10 = vpack.c.bf16 %v105_v7, %v105_v7  ;;  %v5433_v12 = vld [vmem:[#allocation5 + $0x100] ss:$8 sps:$4 sm:$0xff]   ;;  %v5441_v14 = vld [vmem:[#allocation5 + $0x114] ss:$8 sps:$4 sm:$0xff]  }
  0x8a   :  { %1499 = vmatprep.subr.bf16.mxu1 %v5377_v29  ;;  %v5438_v9 = vld [vmem:[#allocation5 + $0x404] ss:$8 sps:$4 sm:$0xff]   ;;  %v5436_v13 = vld [vmem:[#allocation5 + $0x400] ss:$8 sps:$4 sm:$0xff]   ;;  %v5444_v15 = vld [vmem:[#allocation5 + $0x414] ss:$8 sps:$4 sm:$0xff]  }
  0x8b   :  { %v5439_v16 = vld [vmem:[#allocation5 + $0x110] ss:$8 sps:$4 sm:$0xff]   ;;  %v5447_v18 = vld [vmem:[#allocation5 + $0x124] ss:$8 sps:$4 sm:$0xff]   ;;  %v5445_v20 = vld [vmem:[#allocation5 + $0x120] ss:$8 sps:$4 sm:$0xff]  }
  0x8c   :  { %736 = vmatpush1.bf16.msra.mxu0 %v5378_v31  ;;  %v5442_v17 = vld [vmem:[#allocation5 + $0x410] ss:$8 sps:$4 sm:$0xff]   ;;  %v5450_v19 = vld [vmem:[#allocation5 + $0x424] ss:$8 sps:$4 sm:$0xff]   ;;  %v5448_v21 = vld [vmem:[#allocation5 + $0x420] ss:$8 sps:$4 sm:$0xff]  }
  0x8d   :  { %1500 = vmatpush1.bf16.msra.mxu1 %v5375_v30  ;;  %737 = vmatprep.subr.bf16.mxu0 %v5379_v32  ;;  %v5453_v22 = vld [vmem:[#allocation5 + $0x134] ss:$8 sps:$4 sm:$0xff]   ;;  %v5451_v24 = vld [vmem:[#allocation5 + $0x130] ss:$8 sps:$4 sm:$0xff]   ;;  %v5459_v26 = vld [vmem:[#allocation5 + $0x144] ss:$8 sps:$4 sm:$0xff]  }
  0x8e   :  { %1501 = vmatprep.subr.bf16.mxu1 %v5383_v33  ;;  %v5456_v23 = vld [vmem:[#allocation5 + $0x434] ss:$8 sps:$4 sm:$0xff]   ;;  %v5454_v25 = vld [vmem:[#allocation5 + $0x430] ss:$8 sps:$4 sm:$0xff]   ;;  %v5462_v27 = vld [vmem:[#allocation5 + $0x444] ss:$8 sps:$4 sm:$0xff]  }
  0x8f   :  { %v5457_v28 = vld [vmem:[#allocation5 + $0x140] ss:$8 sps:$4 sm:$0xff]   ;;  %v5465_v30 = vld [vmem:[#allocation5 + $0x154] ss:$8 sps:$4 sm:$0xff]   ;;  %v5463_v32 = vld [vmem:[#allocation5 + $0x150] ss:$8 sps:$4 sm:$0xff]  }
  0x90   :  { %738 = vmatpush1.bf16.msra.mxu0 %v5384_v34  ;;  %v5460_v29 = vld [vmem:[#allocation5 + $0x440] ss:$8 sps:$4 sm:$0xff]   ;;  %v5468_v31 = vld [vmem:[#allocation5 + $0x454] ss:$8 sps:$4 sm:$0xff]   ;;  %v5466_v33 = vld [vmem:[#allocation5 + $0x450] ss:$8 sps:$4 sm:$0xff]  }
  0x91   :  { %1502 = vmatpush1.bf16.msra.mxu1 %v5381_v35  ;;  %739 = vmatprep.subr.bf16.mxu0 %v5385_v36  ;;  %v5471_v34 = vld [vmem:[#allocation5 + $0x164] ss:$8 sps:$4 sm:$0xff]   ;;  %v5487_v50 = vld [vmem:[#allocation5 + $0x190] ss:$8 sps:$4 sm:$0xff]  }
  0x92   :  { %1503 = vmatprep.subr.bf16.mxu1 %v5389_v37  ;;  %v5474_v35 = vld [vmem:[#allocation5 + $0x464] ss:$8 sps:$4 sm:$0xff]  }
  0x93   :  { %v108_v36 = vld [vmem:[#allocation3 + $0x18] sm:$0xff] }
  0x94   :  { %740 = vmatpush1.bf16.msra.mxu0 %v5390_v39  ;;  %v6476_v37 = vpack.c.bf16 %v108_v36, %v108_v36  ;;  %v5472_v39 = vld [vmem:[#allocation5 + $0x460] ss:$8 sps:$4 sm:$0xff]   ;;  %v5522_v7 = vld [vmem:[#allocation5 + $0x4e4] ss:$8 sps:$4 sm:$0xff]  }
  0x95   :  { %1504 = vmatpush1.bf16.msra.mxu1 %v5387_v38  ;;  %741 = vmatprep.subr.bf16.mxu0 %v5391_v40  ;;  %v5469_v38 = vld [vmem:[#allocation5 + $0x160] ss:$8 sps:$4 sm:$0xff]   ;;  %v5477_v40 = vld [vmem:[#allocation5 + $0x174] ss:$8 sps:$4 sm:$0xff]   ;;  %v5555_v36 = vld [vmem:[#allocation5 + $0x244] ss:$8 sps:$4 sm:$0xff]  }
  0x96   :  { %1505 = vmatprep.subr.bf16.mxu1 %v5395_v41  ;;  %v5480_v41 = vld [vmem:[#allocation5 + $0x474] ss:$8 sps:$4 sm:$0xff]  }
  0x98   :  { %742 = vmatpush1.bf16.msra.mxu0 %v5396_v42  ;;  %v5475_v42 = vld [vmem:[#allocation5 + $0x170] ss:$8 sps:$4 sm:$0xff]  }
  0x99   :  { %1506 = vmatpush1.bf16.msra.mxu1 %v5393_v43  ;;  %743 = vmatprep.subr.bf16.mxu0 %v5397_v44  ;;  %v5478_v43 = vld [vmem:[#allocation5 + $0x470] ss:$8 sps:$4 sm:$0xff]   ;;  %v5483_v44 = vld [vmem:[#allocation5 + $0x184] ss:$8 sps:$4 sm:$0xff]  }
  0x9a   :  { %1507 = vmatprep.subr.bf16.mxu1 %v5401_v45  ;;  %v5486_v45 = vld [vmem:[#allocation5 + $0x484] ss:$8 sps:$4 sm:$0xff]  }
  0x9c   :  { %744 = vmatpush1.bf16.msra.mxu0 %v5402_v47  ;;  %v5484_v47 = vld [vmem:[#allocation5 + $0x480] ss:$8 sps:$4 sm:$0xff]  }
  0x9d   :  { %1508 = vmatpush1.bf16.msra.mxu1 %v5399_v46  ;;  %745 = vmatprep.subr.bf16.mxu0 %v5403_v48  ;;  %v5481_v46 = vld [vmem:[#allocation5 + $0x180] ss:$8 sps:$4 sm:$0xff]   ;;  %v5489_v48 = vld [vmem:[#allocation5 + $0x194] ss:$8 sps:$4 sm:$0xff]  }
  0x9e   :  { %1509 = vmatprep.subr.bf16.mxu1 %v5407_v49  ;;  %v5492_v49 = vld [vmem:[#allocation5 + $0x494] ss:$8 sps:$4 sm:$0xff]  }
  0xa0   :  { %746 = vmatpush1.bf16.msra.mxu0 %v5408_v51  ;;  %v5490_v51 = vld [vmem:[#allocation5 + $0x490] ss:$8 sps:$4 sm:$0xff]  }
  0xa1   :  { %1510 = vmatpush1.bf16.msra.mxu1 %v5405_v53  ;;  %747 = vmatprep.subr.bf16.mxu0 %v5409_v54  ;;  %v5495_v53 = vld [vmem:[#allocation5 + $0x1a4] ss:$8 sps:$4 sm:$0xff]  }
  0xa2   :  { %1511 = vmatprep.subr.bf16.mxu1 %v5413_v55  ;;  %v5498_v54 = vld [vmem:[#allocation5 + $0x4a4] ss:$8 sps:$4 sm:$0xff]   ;;  %v5493_v55 = vld [vmem:[#allocation5 + $0x1a0] ss:$8 sps:$4 sm:$0xff]  }
  0xa4   :  { %748 = vmatpush1.bf16.msra.mxu0 %v5414_v57  ;;  %v5501_v57 = vld [vmem:[#allocation5 + $0x1b4] ss:$8 sps:$4 sm:$0xff]  }
  0xa5   :  { %1512 = vmatpush1.bf16.msra.mxu1 %v5411_v56  ;;  %749 = vmatprep.subr.bf16.mxu0 %v5415_v58  ;;  %v5496_v56 = vld [vmem:[#allocation5 + $0x4a0] ss:$8 sps:$4 sm:$0xff]   ;;  %v5504_v58 = vld [vmem:[#allocation5 + $0x4b4] ss:$8 sps:$4 sm:$0xff]  }
  0xa6   :  { %1513 = vmatprep.subr.bf16.mxu1 %v5419_v59  ;;  %v5499_v59 = vld [vmem:[#allocation5 + $0x1b0] ss:$8 sps:$4 sm:$0xff]  }
  0xa8   :  { %750 = vmatpush1.bf16.msra.mxu0 %v5420_v61  ;;  %v5507_v61 = vld [vmem:[#allocation5 + $0x1c4] ss:$8 sps:$4 sm:$0xff]  }
  0xa9   :  { %1514 = vmatpush1.bf16.msra.mxu1 %v5417_v60  ;;  %751 = vmatprep.subr.bf16.mxu0 %v5421_v62  ;;  %v5502_v60 = vld [vmem:[#allocation5 + $0x4b0] ss:$8 sps:$4 sm:$0xff]   ;;  %v5510_v62 = vld [vmem:[#allocation5 + $0x4c4] ss:$8 sps:$4 sm:$0xff]  }
  0xaa   :  { %1515 = vmatprep.subr.bf16.mxu1 %v5425_v63  ;;  %v5505_v63 = vld [vmem:[#allocation5 + $0x1c0] ss:$8 sps:$4 sm:$0xff]  }
  0xac   :  { %752 = vmatpush1.bf16.msra.mxu0 %v5426_v2  ;;  %v5513_v2 = vld [vmem:[#allocation5 + $0x1d4] ss:$8 sps:$4 sm:$0xff]  }
  0xad   :  { %1516 = vmatpush1.bf16.msra.mxu1 %v5423_v0  ;;  %753 = vmatprep.subr.bf16.mxu0 %v5427_v3  ;;  %v5508_v0 = vld [vmem:[#allocation5 + $0x4c0] ss:$8 sps:$4 sm:$0xff]   ;;  %v5516_v3 = vld [vmem:[#allocation5 + $0x4d4] ss:$8 sps:$4 sm:$0xff]  }
  0xae   :  { %1517 = vmatprep.subr.bf16.mxu1 %v5431_v4  ;;  %v5511_v4 = vld [vmem:[#allocation5 + $0x1d0] ss:$8 sps:$4 sm:$0xff]  }
  0xb0   :  { %754 = vmatpush1.bf16.msra.mxu0 %v5432_v6  ;;  %v5519_v6 = vld [vmem:[#allocation5 + $0x1e4] ss:$8 sps:$4 sm:$0xff]  }
  0xb1   :  { %1518 = vmatpush1.bf16.msra.mxu1 %v5429_v5  ;;  %764 = vmatprep.subr.bf16.mxu0 %v5435_v8  ;;  %v5514_v5 = vld [vmem:[#allocation5 + $0x4d0] ss:$8 sps:$4 sm:$0xff]   ;;  %v5517_v8 = vld [vmem:[#allocation5 + $0x1e0] ss:$8 sps:$4 sm:$0xff]  }
  0xb2   :  { %1519 = vmatprep.subr.bf16.mxu1 %v5438_v9  ;;  %v5520_v9 = vld [vmem:[#allocation5 + $0x4e0] ss:$8 sps:$4 sm:$0xff]  }
  0xb3   :  { %756 = vmatmul.mubr.bf16.vlgmr.msra.gmra.mrb[0].mxu0 %v6472_v10 }
  0xb4   :  { %765 = vmatpush1.bf16.msra.mxu0 %v5433_v12  ;;  %796 = vmatprep.mubr.bf16.mxu0 %v6476_v37  ;;  %v5525_v12 = vld [vmem:[#allocation5 + $0x1f4] ss:$8 sps:$4 sm:$0xff]  }
  0xb5   :  { %1520 = vmatpush1.bf16.msra.mxu1 %v5436_v13  ;;  %766 = vmatprep.subr.bf16.mxu0 %v5441_v14  ;;  %v5528_v13 = vld [vmem:[#allocation5 + $0x4f4] ss:$8 sps:$4 sm:$0xff]   ;;  %v5523_v14 = vld [vmem:[#allocation5 + $0x1f0] ss:$8 sps:$4 sm:$0xff]  }
  0xb6   :  { %1530 = vmatprep.subr.bf16.mxu1 %v5444_v15  ;;  %v107_v15 = vld [vmem:[#allocation3 + $0x10] sm:$0xff] }
  0xb8   :  { %767 = vmatpush1.bf16.msra.mxu0 %v5439_v16  ;;  %1522 = vmatmul.mubr.bf16.vlgmr.msra.gmra.mrb[4].mxu1 %v6472_v10  ;;  %v5526_v16 = vld [vmem:[#allocation5 + $0x4f0] ss:$8 sps:$4 sm:$0xff]  }
  0xb9   :  { %1531 = vmatpush1.bf16.msra.mxu1 %v5442_v17  ;;  %768 = vmatprep.subr.bf16.mxu0 %v5447_v18  ;;  %v5531_v17 = vld [vmem:[#allocation5 + $0x204] ss:$8 sps:$4 sm:$0xff]  }
  0xba   :  { %1532 = vmatprep.subr.bf16.mxu1 %v5450_v19  ;;  %1562 = vmatprep.mubr.bf16.mxu1 %v6476_v37  ;;  %v5534_v18 = vld [vmem:[#allocation5 + $0x504] ss:$8 sps:$4 sm:$0xff]   ;;  %v6480_v19 = vpack.c.bf16 %v107_v15, %v107_v15  ;;  %v5607_v15 = vld [vmem:[#allocation5 + $0x2d0] ss:$8 sps:$4 sm:$0xff]  }
  0xbc   :  { %769 = vmatpush1.bf16.msra.mxu0 %v5445_v20  ;;  %v5529_v20 = vld [vmem:[#allocation5 + $0x200] ss:$8 sps:$4 sm:$0xff]  }
  0xbd   :  { %1533 = vmatpush1.bf16.msra.mxu1 %v5448_v21  ;;  %770 = vmatprep.subr.bf16.mxu0 %v5453_v22  ;;  %v5532_v21 = vld [vmem:[#allocation5 + $0x500] ss:$8 sps:$4 sm:$0xff]   ;;  %v5537_v22 = vld [vmem:[#allocation5 + $0x214] ss:$8 sps:$4 sm:$0xff]  }
  0xbe   :  { %1534 = vmatprep.subr.bf16.mxu1 %v5456_v23  ;;  %v110_v23 = vld [vmem:[#allocation3 + $0x28] sm:$0xff] }
  0xc0   :  { %771 = vmatpush1.bf16.msra.mxu0 %v5451_v24  ;;  %v5540_v24 = vld [vmem:[#allocation5 + $0x514] ss:$8 sps:$4 sm:$0xff]  }
  0xc1   :  { %1535 = vmatpush1.bf16.msra.mxu1 %v5454_v25  ;;  %772 = vmatprep.subr.bf16.mxu0 %v5459_v26  ;;  %v6482_v25 = vpack.c.bf16 %v110_v23, %v110_v23  ;;  %v5535_v26 = vld [vmem:[#allocation5 + $0x210] ss:$8 sps:$4 sm:$0xff]   ;;  %v5624_v23 = vld [vmem:[#allocation5 + $0x5f4] ss:$8 sps:$4 sm:$0xff]  }
  0xc2   :  { %1536 = vmatprep.subr.bf16.mxu1 %v5462_v27  ;;  %v5538_v27 = vld [vmem:[#allocation5 + $0x510] ss:$8 sps:$4 sm:$0xff]  }
  0xc4   :  { %773 = vmatpush1.bf16.msra.mxu0 %v5457_v28  ;;  %v5543_v28 = vld [vmem:[#allocation5 + $0x224] ss:$8 sps:$4 sm:$0xff]  }
  0xc5   :  { %1537 = vmatpush1.bf16.msra.mxu1 %v5460_v29  ;;  %774 = vmatprep.subr.bf16.mxu0 %v5465_v30  ;;  %v5546_v29 = vld [vmem:[#allocation5 + $0x524] ss:$8 sps:$4 sm:$0xff]   ;;  %v5541_v30 = vld [vmem:[#allocation5 + $0x220] ss:$8 sps:$4 sm:$0xff]  }
  0xc6   :  { %1538 = vmatprep.subr.bf16.mxu1 %v5468_v31  ;;  %v5544_v31 = vld [vmem:[#allocation5 + $0x520] ss:$8 sps:$4 sm:$0xff]  }
  0xc8   :  { %775 = vmatpush1.bf16.msra.mxu0 %v5463_v32  ;;  %v5549_v32 = vld [vmem:[#allocation5 + $0x234] ss:$8 sps:$4 sm:$0xff]  }
  0xc9   :  { %1539 = vmatpush1.bf16.msra.mxu1 %v5466_v33  ;;  %776 = vmatprep.subr.bf16.mxu0 %v5471_v34  ;;  %v5552_v33 = vld [vmem:[#allocation5 + $0x534] ss:$8 sps:$4 sm:$0xff]   ;;  %v5547_v34 = vld [vmem:[#allocation5 + $0x230] ss:$8 sps:$4 sm:$0xff]  }
  0xca   :  { %1540 = vmatprep.subr.bf16.mxu1 %v5474_v35  ;;  %v5550_v35 = vld [vmem:[#allocation5 + $0x530] ss:$8 sps:$4 sm:$0xff]  }
  0xcc   :  { %777 = vmatpush1.bf16.msra.mxu0 %v5469_v38  ;;  %v5558_v38 = vld [vmem:[#allocation5 + $0x544] ss:$8 sps:$4 sm:$0xff]  }
  0xcd   :  { %1541 = vmatpush1.bf16.msra.mxu1 %v5472_v39  ;;  %778 = vmatprep.subr.bf16.mxu0 %v5477_v40  ;;  %v5553_v39 = vld [vmem:[#allocation5 + $0x240] ss:$8 sps:$4 sm:$0xff]  }
  0xce   :  { %1542 = vmatprep.subr.bf16.mxu1 %v5480_v41  ;;  %v5556_v40 = vld [vmem:[#allocation5 + $0x540] ss:$8 sps:$4 sm:$0xff]   ;;  %v5561_v41 = vld [vmem:[#allocation5 + $0x254] ss:$8 sps:$4 sm:$0xff]  }
  0xd0   :  { %779 = vmatpush1.bf16.msra.mxu0 %v5475_v42  ;;  %v5564_v42 = vld [vmem:[#allocation5 + $0x554] ss:$8 sps:$4 sm:$0xff]  }
  0xd1   :  { %1543 = vmatpush1.bf16.msra.mxu1 %v5478_v43  ;;  %780 = vmatprep.subr.bf16.mxu0 %v5483_v44  ;;  %v5559_v43 = vld [vmem:[#allocation5 + $0x250] ss:$8 sps:$4 sm:$0xff]  }
  0xd2   :  { %1544 = vmatprep.subr.bf16.mxu1 %v5486_v45  ;;  %v5562_v44 = vld [vmem:[#allocation5 + $0x550] ss:$8 sps:$4 sm:$0xff]   ;;  %v5567_v45 = vld [vmem:[#allocation5 + $0x264] ss:$8 sps:$4 sm:$0xff]  }
  0xd4   :  { %781 = vmatpush1.bf16.msra.mxu0 %v5481_v46  ;;  %v5570_v46 = vld [vmem:[#allocation5 + $0x564] ss:$8 sps:$4 sm:$0xff]  }
  0xd5   :  { %1545 = vmatpush1.bf16.msra.mxu1 %v5484_v47  ;;  %782 = vmatprep.subr.bf16.mxu0 %v5489_v48  ;;  %v5565_v47 = vld [vmem:[#allocation5 + $0x260] ss:$8 sps:$4 sm:$0xff]  }
  0xd6   :  { %1546 = vmatprep.subr.bf16.mxu1 %v5492_v49  ;;  %v5568_v48 = vld [vmem:[#allocation5 + $0x560] ss:$8 sps:$4 sm:$0xff]   ;;  %v5573_v49 = vld [vmem:[#allocation5 + $0x274] ss:$8 sps:$4 sm:$0xff]  }
  0xd8   :  { %783 = vmatpush1.bf16.msra.mxu0 %v5487_v50  ;;  %v5576_v50 = vld [vmem:[#allocation5 + $0x574] ss:$8 sps:$4 sm:$0xff]  }
  0xd9   :  { %1547 = vmatpush1.bf16.msra.mxu1 %v5490_v51  ;;  %784 = vmatprep.subr.bf16.mxu0 %v5495_v53  ;;  %v5571_v51 = vld [vmem:[#allocation5 + $0x270] ss:$8 sps:$4 sm:$0xff]  }
  0xda   :  { %1548 = vmatprep.subr.bf16.mxu1 %v5498_v54  ;;  %v5574_v53 = vld [vmem:[#allocation5 + $0x570] ss:$8 sps:$4 sm:$0xff]   ;;  %v5579_v54 = vld [vmem:[#allocation5 + $0x284] ss:$8 sps:$4 sm:$0xff]  }
  0xdc   :  { %785 = vmatpush1.bf16.msra.mxu0 %v5493_v55  ;;  %v5582_v55 = vld [vmem:[#allocation5 + $0x584] ss:$8 sps:$4 sm:$0xff]  }
  0xdd   :  { %1549 = vmatpush1.bf16.msra.mxu1 %v5496_v56  ;;  %786 = vmatprep.subr.bf16.mxu0 %v5501_v57  ;;  %v5577_v56 = vld [vmem:[#allocation5 + $0x280] ss:$8 sps:$4 sm:$0xff]  }
  0xde   :  { %1550 = vmatprep.subr.bf16.mxu1 %v5504_v58  ;;  %v5580_v57 = vld [vmem:[#allocation5 + $0x580] ss:$8 sps:$4 sm:$0xff]   ;;  %v5585_v58 = vld [vmem:[#allocation5 + $0x294] ss:$8 sps:$4 sm:$0xff]  }
  0xe0   :  { %787 = vmatpush1.bf16.msra.mxu0 %v5499_v59  ;;  %v5588_v59 = vld [vmem:[#allocation5 + $0x594] ss:$8 sps:$4 sm:$0xff]  }
  0xe1   :  { %1551 = vmatpush1.bf16.msra.mxu1 %v5502_v60  ;;  %788 = vmatprep.subr.bf16.mxu0 %v5507_v61  ;;  %v5583_v60 = vld [vmem:[#allocation5 + $0x290] ss:$8 sps:$4 sm:$0xff]  }
  0xe2   :  { %1552 = vmatprep.subr.bf16.mxu1 %v5510_v62  ;;  %v5586_v61 = vld [vmem:[#allocation5 + $0x590] ss:$8 sps:$4 sm:$0xff]   ;;  %v5591_v62 = vld [vmem:[#allocation5 + $0x2a4] ss:$8 sps:$4 sm:$0xff]  }
  0xe4   :  { %789 = vmatpush1.bf16.msra.mxu0 %v5505_v63  ;;  %v5594_v63 = vld [vmem:[#allocation5 + $0x5a4] ss:$8 sps:$4 sm:$0xff]  }
  0xe5   :  { %1553 = vmatpush1.bf16.msra.mxu1 %v5508_v0  ;;  %790 = vmatprep.subr.bf16.mxu0 %v5513_v2  ;;  %v5589_v0 = vld [vmem:[#allocation5 + $0x2a0] ss:$8 sps:$4 sm:$0xff]  }
  0xe6   :  { %1554 = vmatprep.subr.bf16.mxu1 %v5516_v3  ;;  %v5592_v2 = vld [vmem:[#allocation5 + $0x5a0] ss:$8 sps:$4 sm:$0xff]   ;;  %v5597_v3 = vld [vmem:[#allocation5 + $0x2b4] ss:$8 sps:$4 sm:$0xff]  }
  0xe8   :  { %791 = vmatpush1.bf16.msra.mxu0 %v5511_v4  ;;  %v5600_v4 = vld [vmem:[#allocation5 + $0x5b4] ss:$8 sps:$4 sm:$0xff]  }
  0xe9   :  { %1555 = vmatpush1.bf16.msra.mxu1 %v5514_v5  ;;  %792 = vmatprep.subr.bf16.mxu0 %v5519_v6  ;;  %v5595_v5 = vld [vmem:[#allocation5 + $0x2b0] ss:$8 sps:$4 sm:$0xff]  }
  0xea   :  { %1556 = vmatprep.subr.bf16.mxu1 %v5522_v7  ;;  %v5598_v6 = vld [vmem:[#allocation5 + $0x5b0] ss:$8 sps:$4 sm:$0xff]   ;;  %v5603_v7 = vld [vmem:[#allocation5 + $0x2c4] ss:$8 sps:$4 sm:$0xff]  }
  0xec   :  { %793 = vmatpush1.bf16.msra.mxu0 %v5517_v8  ;;  %v5606_v8 = vld [vmem:[#allocation5 + $0x5c4] ss:$8 sps:$4 sm:$0xff]  }
  0xed   :  { %1557 = vmatpush1.bf16.msra.mxu1 %v5520_v9  ;;  %794 = vmatprep.subr.bf16.mxu0 %v5525_v12  ;;  %v5601_v9 = vld [vmem:[#allocation5 + $0x2c0] ss:$8 sps:$4 sm:$0xff]  }
  0xee   :  { %1558 = vmatprep.subr.bf16.mxu1 %v5528_v13  ;;  %v5604_v12 = vld [vmem:[#allocation5 + $0x5c0] ss:$8 sps:$4 sm:$0xff]   ;;  %v5609_v13 = vld [vmem:[#allocation5 + $0x2d4] ss:$8 sps:$4 sm:$0xff]  }
  0xf0   :  { %795 = vmatpush1.bf16.msra.mxu0 %v5523_v14  ;;  %v5612_v14 = vld [vmem:[#allocation5 + $0x5d4] ss:$8 sps:$4 sm:$0xff]  }
  0xf1   :  { %1559 = vmatpush1.bf16.msra.mxu1 %v5526_v16  ;;  %805 = vmatprep.subr.bf16.mxu0 %v5531_v17  ;;  %v5610_v16 = vld [vmem:[#allocation5 + $0x5d0] ss:$8 sps:$4 sm:$0xff]   ;;  %v5615_v17 = vld [vmem:[#allocation5 + $0x2e4] ss:$8 sps:$4 sm:$0xff]  }
  0xf2   :  { %1560 = vmatprep.subr.bf16.mxu1 %v5534_v18  ;;  %v5618_v18 = vld [vmem:[#allocation5 + $0x5e4] ss:$8 sps:$4 sm:$0xff]  }
  0xf3   :  { %797 = vmatmul.mubr.bf16.vlgmr.msra.gmra.mrb[0].mxu0 %v6480_v19 }
  0xf4   :  { %806 = vmatpush1.bf16.msra.mxu0 %v5529_v20  ;;  %837 = vmatprep.mubr.bf16.mxu0 %v6482_v25  ;;  %v5613_v20 = vld [vmem:[#allocation5 + $0x2e0] ss:$8 sps:$4 sm:$0xff]  }
  0xf5   :  { %1561 = vmatpush1.bf16.msra.mxu1 %v5532_v21  ;;  %807 = vmatprep.subr.bf16.mxu0 %v5537_v22  ;;  %v5616_v21 = vld [vmem:[#allocation5 + $0x5e0] ss:$8 sps:$4 sm:$0xff]   ;;  %v5621_v22 = vld [vmem:[#allocation5 + $0x2f4] ss:$8 sps:$4 sm:$0xff]  }
  0xf6   :  { %1571 = vmatprep.subr.bf16.mxu1 %v5540_v24  ;;  %v5619_v24 = vld [vmem:[#allocation5 + $0x2f0] ss:$8 sps:$4 sm:$0xff]  }
  0xf8   :  { %808 = vmatpush1.bf16.msra.mxu0 %v5535_v26  ;;  %1563 = vmatmul.mubr.bf16.vlgmr.msra.gmra.mrb[4].mxu1 %v6480_v19  ;;  %v5622_v26 = vld [vmem:[#allocation5 + $0x5f0] ss:$8 sps:$4 sm:$0xff]  }
  0xf9   :  { %1572 = vmatpush1.bf16.msra.mxu1 %v5538_v27  ;;  %809 = vmatprep.subr.bf16.mxu0 %v5543_v28  ;;  %v109_v27 = vld [vmem:[#allocation3 + $0x20] sm:$0xff] }
  0xfa   :  { %1573 = vmatprep.subr.bf16.mxu1 %v5546_v29  ;;  %1603 = vmatprep.mubr.bf16.mxu1 %v6482_v25  ;;  %v5630_v28 = vld [vmem:[#allocation5 + $0x624] ss:$8 sps:$4 sm:$0xff]  }
  0xfb   :  { %v5627_v29 = vld [vmem:[#allocation5 + $0x604] ss:$8 sps:$4 sm:$0xff]  }
  0xfc   :  { %810 = vmatpush1.bf16.msra.mxu0 %v5541_v30  ;;  %v6488_v30 = vpack.c.bf16 %v109_v27, %v109_v27  ;;  %v5702_v27 = vld [vmem:[#allocation5 + $0x9b4] ss:$8 sps:$4 sm:$0xff]  }
  0xfd   :  { %1574 = vmatpush1.bf16.msra.mxu1 %v5544_v31  ;;  %811 = vmatprep.subr.bf16.mxu0 %v5549_v32  ;;  %v5625_v31 = vld [vmem:[#allocation5 + $0x600] ss:$8 sps:$4 sm:$0xff]  }
  0xfe   :  { %1575 = vmatprep.subr.bf16.mxu1 %v5552_v33  ;;  %v5628_v32 = vld [vmem:[#allocation5 + $0x620] ss:$8 sps:$4 sm:$0xff]   ;;  %v5633_v33 = vld [vmem:[#allocation5 + $0x634] ss:$8 sps:$4 sm:$0xff]  }
 0x100   :  { %812 = vmatpush1.bf16.msra.mxu0 %v5547_v34  ;;  %v5639_v34 = vld [vmem:[#allocation5 + $0x614] ss:$8 sps:$4 sm:$0xff]  }
 0x101   :  { %1576 = vmatpush1.bf16.msra.mxu1 %v5550_v35  ;;  %813 = vmatprep.subr.bf16.mxu0 %v5555_v36  ;;  %v5631_v35 = vld [vmem:[#allocation5 + $0x630] ss:$8 sps:$4 sm:$0xff]   ;;  %v5636_v36 = vld [vmem:[#allocation5 + $0x644] ss:$8 sps:$4 sm:$0xff]  }
 0x102   :  { %1577 = vmatprep.subr.bf16.mxu1 %v5558_v38  ;;  %v5637_v38 = vld [vmem:[#allocation5 + $0x610] ss:$8 sps:$4 sm:$0xff]  }
 0x104   :  { %814 = vmatpush1.bf16.msra.mxu0 %v5553_v39  ;;  %v5648_v39 = vld [vmem:[#allocation5 + $0x924] ss:$8 sps:$4 sm:$0xff]  }
 0x105   :  { %1578 = vmatpush1.bf16.msra.mxu1 %v5556_v40  ;;  %815 = vmatprep.subr.bf16.mxu0 %v5561_v41  ;;  %v5634_v40 = vld [vmem:[#allocation5 + $0x640] ss:$8 sps:$4 sm:$0xff]   ;;  %v5642_v41 = vld [vmem:[#allocation5 + $0x654] ss:$8 sps:$4 sm:$0xff]  }
 0x106   :  { %1579 = vmatprep.subr.bf16.mxu1 %v5564_v42  ;;  %v5640_v42 = vld [vmem:[#allocation5 + $0x650] ss:$8 sps:$4 sm:$0xff]  }
 0x108   :  { %816 = vmatpush1.bf16.msra.mxu0 %v5559_v43  ;;  %v5645_v43 = vld [vmem:[#allocation5 + $0x664] ss:$8 sps:$4 sm:$0xff]  }
 0x109   :  { %1580 = vmatpush1.bf16.msra.mxu1 %v5562_v44  ;;  %817 = vmatprep.subr.bf16.mxu0 %v5567_v45  ;;  %v5643_v44 = vld [vmem:[#allocation5 + $0x660] ss:$8 sps:$4 sm:$0xff]  }
 0x10a   :  { %1581 = vmatprep.subr.bf16.mxu1 %v5570_v46  ;;  %v5646_v45 = vld [vmem:[#allocation5 + $0x920] ss:$8 sps:$4 sm:$0xff]   ;;  %v5651_v46 = vld [vmem:[#allocation5 + $0x674] ss:$8 sps:$4 sm:$0xff]  }
 0x10c   :  { %818 = vmatpush1.bf16.msra.mxu0 %v5565_v47  ;;  %v5654_v47 = vld [vmem:[#allocation5 + $0x934] ss:$8 sps:$4 sm:$0xff]  }
 0x10d   :  { %1582 = vmatpush1.bf16.msra.mxu1 %v5568_v48  ;;  %819 = vmatprep.subr.bf16.mxu0 %v5573_v49  ;;  %v5649_v48 = vld [vmem:[#allocation5 + $0x670] ss:$8 sps:$4 sm:$0xff]   ;;  %v5657_v49 = vld [vmem:[#allocation5 + $0x684] ss:$8 sps:$4 sm:$0xff]  }
 0x10e   :  { %1583 = vmatprep.subr.bf16.mxu1 %v5576_v50  ;;  %v5652_v50 = vld [vmem:[#allocation5 + $0x930] ss:$8 sps:$4 sm:$0xff]  }
 0x110   :  { %820 = vmatpush1.bf16.msra.mxu0 %v5571_v51  ;;  %v5655_v51 = vld [vmem:[#allocation5 + $0x680] ss:$8 sps:$4 sm:$0xff]  }
 0x111   :  { %1584 = vmatpush1.bf16.msra.mxu1 %v5574_v53  ;;  %821 = vmatprep.subr.bf16.mxu0 %v5579_v54  ;;  %v5663_v53 = vld [vmem:[#allocation5 + $0x694] ss:$8 sps:$4 sm:$0xff]   ;;  %v5660_v54 = vld [vmem:[#allocation5 + $0x944] ss:$8 sps:$4 sm:$0xff]  }
 0x112   :  { %1585 = vmatprep.subr.bf16.mxu1 %v5582_v55  ;;  %v5658_v55 = vld [vmem:[#allocation5 + $0x940] ss:$8 sps:$4 sm:$0xff]  }
 0x114   :  { %822 = vmatpush1.bf16.msra.mxu0 %v5577_v56  ;;  %v5661_v56 = vld [vmem:[#allocation5 + $0x690] ss:$8 sps:$4 sm:$0xff]  }
 0x115   :  { %1586 = vmatpush1.bf16.msra.mxu1 %v5580_v57  ;;  %823 = vmatprep.subr.bf16.mxu0 %v5585_v58  ;;  %v5669_v57 = vld [vmem:[#allocation5 + $0x6a4] ss:$8 sps:$4 sm:$0xff]   ;;  %v5666_v58 = vld [vmem:[#allocation5 + $0x954] ss:$8 sps:$4 sm:$0xff]  }
 0x116   :  { %1587 = vmatprep.subr.bf16.mxu1 %v5588_v59  ;;  %v5664_v59 = vld [vmem:[#allocation5 + $0x950] ss:$8 sps:$4 sm:$0xff]  }
 0x118   :  { %824 = vmatpush1.bf16.msra.mxu0 %v5583_v60  ;;  %v5667_v60 = vld [vmem:[#allocation5 + $0x6a0] ss:$8 sps:$4 sm:$0xff]  }
 0x119   :  { %1588 = vmatpush1.bf16.msra.mxu1 %v5586_v61  ;;  %825 = vmatprep.subr.bf16.mxu0 %v5591_v62  ;;  %v5675_v61 = vld [vmem:[#allocation5 + $0x6b4] ss:$8 sps:$4 sm:$0xff]   ;;  %v5672_v62 = vld [vmem:[#allocation5 + $0x964] ss:$8 sps:$4 sm:$0xff]  }
 0x11a   :  { %1589 = vmatprep.subr.bf16.mxu1 %v5594_v63  ;;  %v5670_v63 = vld [vmem:[#allocation5 + $0x960] ss:$8 sps:$4 sm:$0xff]  }
 0x11c   :  { %826 = vmatpush1.bf16.msra.mxu0 %v5589_v0  ;;  %v5673_v0 = vld [vmem:[#allocation5 + $0x6b0] ss:$8 sps:$4 sm:$0xff]  }
 0x11d   :  { %1590 = vmatpush1.bf16.msra.mxu1 %v5592_v2  ;;  %827 = vmatprep.subr.bf16.mxu0 %v5597_v3  ;;  %v5681_v2 = vld [vmem:[#allocation5 + $0x6c4] ss:$8 sps:$4 sm:$0xff]   ;;  %v5678_v3 = vld [vmem:[#allocation5 + $0x974] ss:$8 sps:$4 sm:$0xff]  }
 0x11e   :  { %1591 = vmatprep.subr.bf16.mxu1 %v5600_v4  ;;  %v5676_v4 = vld [vmem:[#allocation5 + $0x970] ss:$8 sps:$4 sm:$0xff]  }
 0x120   :  { %828 = vmatpush1.bf16.msra.mxu0 %v5595_v5  ;;  %v5679_v5 = vld [vmem:[#allocation5 + $0x6c0] ss:$8 sps:$4 sm:$0xff]  }
 0x121   :  { %1592 = vmatpush1.bf16.msra.mxu1 %v5598_v6  ;;  %829 = vmatprep.subr.bf16.mxu0 %v5603_v7  ;;  %v5687_v6 = vld [vmem:[#allocation5 + $0x6d4] ss:$8 sps:$4 sm:$0xff]   ;;  %v5684_v7 = vld [vmem:[#allocation5 + $0x984] ss:$8 sps:$4 sm:$0xff]  }
 0x122   :  { %1593 = vmatprep.subr.bf16.mxu1 %v5606_v8  ;;  %v5682_v8 = vld [vmem:[#allocation5 + $0x980] ss:$8 sps:$4 sm:$0xff]  }
 0x124   :  { %830 = vmatpush1.bf16.msra.mxu0 %v5601_v9  ;;  %v5685_v9 = vld [vmem:[#allocation5 + $0x6d0] ss:$8 sps:$4 sm:$0xff]  }
 0x125   :  { %1594 = vmatpush1.bf16.msra.mxu1 %v5604_v12  ;;  %831 = vmatprep.subr.bf16.mxu0 %v5609_v13  ;;  %v5693_v12 = vld [vmem:[#allocation5 + $0x6e4] ss:$8 sps:$4 sm:$0xff]  }
 0x126   :  { %1595 = vmatprep.subr.bf16.mxu1 %v5612_v14  ;;  %v5690_v14 = vld [vmem:[#allocation5 + $0x994] ss:$8 sps:$4 sm:$0xff]  }
 0x128   :  { %832 = vmatpush1.bf16.msra.mxu0 %v5607_v15 }
 0x129   :  { %1596 = vmatpush1.bf16.msra.mxu1 %v5610_v16  ;;  %833 = vmatprep.subr.bf16.mxu0 %v5615_v17  ;;  %v5688_v17 = vld [vmem:[#allocation5 + $0x990] ss:$8 sps:$4 sm:$0xff]  }
 0x12a   :  { %1597 = vmatprep.subr.bf16.mxu1 %v5618_v18  ;;  %v5691_v18 = vld [vmem:[#allocation5 + $0x6e0] ss:$8 sps:$4 sm:$0xff]  }
 0x12c   :  { %834 = vmatpush1.bf16.msra.mxu0 %v5613_v20 }
 0x12d   :  { %1598 = vmatpush1.bf16.msra.mxu1 %v5616_v21  ;;  %835 = vmatprep.subr.bf16.mxu0 %v5621_v22  ;;  %v5699_v21 = vld [vmem:[#allocation5 + $0x6f4] ss:$8 sps:$4 sm:$0xff]   ;;  %v5696_v22 = vld [vmem:[#allocation5 + $0x9a4] ss:$8 sps:$4 sm:$0xff]  }
 0x12e   :  { %1599 = vmatprep.subr.bf16.mxu1 %v5624_v23  ;;  %v5694_v23 = vld [vmem:[#allocation5 + $0x9a0] ss:$8 sps:$4 sm:$0xff]  }
 0x130   :  { %836 = vmatpush1.bf16.msra.mxu0 %v5619_v24  ;;  %v5697_v24 = vld [vmem:[#allocation5 + $0x6f0] ss:$8 sps:$4 sm:$0xff]  }
 0x131   :  { %1600 = vmatpush1.bf16.msra.mxu1 %v5622_v26  ;;  %2257 = vmatprep.subr.bf16.mxu0 %v5630_v28  ;;  %v5705_v26 = vld [vmem:[#allocation5 + $0x704] ss:$8 sps:$4 sm:$0xff]   ;;  %v5700_v28 = vld [vmem:[#allocation5 + $0x9b0] ss:$8 sps:$4 sm:$0xff]  }
 0x132   :  { %1601 = vmatprep.subr.bf16.mxu1 %v5627_v29  ;;  %v5703_v29 = vld [vmem:[#allocation5 + $0x700] ss:$8 sps:$4 sm:$0xff]  }
 0x133   :  { %838 = vmatmul.mubr.bf16.vlgmr.msra.gmra.mrb[0].mxu0 %v6488_v30 }
 0x134   :  { %2258 = vmatpush1.bf16.msra.mxu0 %v5628_v32  ;;  %2289 = vmatprep.mubr.bf16.mxu0 %v6468_v52  ;;  %v5708_v32 = vld [vmem:[#allocation5 + $0x9c4] ss:$8 sps:$4 sm:$0xff]  }
 0x135   :  { %1602 = vmatpush1.bf16.msra.mxu1 %v5625_v31  ;;  %2259 = vmatprep.subr.bf16.mxu0 %v5633_v33  ;;  %v5711_v31 = vld [vmem:[#allocation5 + $0x714] ss:$8 sps:$4 sm:$0xff]   ;;  %v5709_v33 = vld [vmem:[#allocation5 + $0x710] ss:$8 sps:$4 sm:$0xff]  }
 0x136   :  { %1612 = vmatprep.subr.bf16.mxu1 %v5639_v34  ;;  %v5706_v34 = vld [vmem:[#allocation5 + $0x9c0] ss:$8 sps:$4 sm:$0xff]  }
 0x138   :  { %1604 = vmatmul.mubr.bf16.vlgmr.msra.gmra.mrb[4].mxu1 %v6488_v30  ;;  %2260 = vmatpush1.bf16.msra.mxu0 %v5631_v35  ;;  %v5717_v35 = vld [vmem:[#allocation5 + $0x724] ss:$8 sps:$4 sm:$0xff]  }
 0x139   :  { %2261 = vmatprep.subr.bf16.mxu0 %v5636_v36  ;;  %1613 = vmatpush1.bf16.msra.mxu1 %v5637_v38  ;;  %v5714_v36 = vld [vmem:[#allocation5 + $0x9d4] ss:$8 sps:$4 sm:$0xff]   ;;  %v5715_v38 = vld [vmem:[#allocation5 + $0x720] ss:$8 sps:$4 sm:$0xff]  }
 0x13a   :  { %1644 = vmatprep.mubr.bf16.mxu1 %v6340_v1  ;;  %2380 = vmatprep.subr.bf16.mxu1 %v5648_v39  ;;  %v5712_v39 = vld [vmem:[#allocation5 + $0x9d0] ss:$8 sps:$4 sm:$0xff]  }
 0x13c   :  { %2262 = vmatpush1.bf16.msra.mxu0 %v5634_v40  ;;  %v5720_v40 = vld [vmem:[#allocation5 + $0x9e4] ss:$8 sps:$4 sm:$0xff]  }
 0x13d   :  { %2263 = vmatprep.subr.bf16.mxu0 %v5642_v41  ;;  %v5723_v41 = vld [vmem:[#allocation5 + $0x734] ss:$8 sps:$4 sm:$0xff]  }
 0x140   :  { %2264 = vmatpush1.bf16.msra.mxu0 %v5640_v42  ;;  %v5718_v42 = vld [vmem:[#allocation5 + $0x9e0] ss:$8 sps:$4 sm:$0xff]  }
 0x141   :  { %2265 = vmatprep.subr.bf16.mxu0 %v5645_v43  ;;  %v5721_v43 = vld [vmem:[#allocation5 + $0x730] ss:$8 sps:$4 sm:$0xff]  }
 0x144   :  { %4857 = vmatmul.mubr.msk.bf16.vlgmr.msra.gmra.mrb[4].mxu1 %vm719_vm0, %v6464_v11  ;;  %2266 = vmatpush1.bf16.msra.mxu0 %v5643_v44  ;;  %v5726_v44 = vld [vmem:[#allocation5 + $0x9f4] ss:$8 sps:$4 sm:$0xff]  }
 0x145   :  { %2267 = vmatprep.subr.bf16.mxu0 %v5651_v46  ;;  %2381 = vmatpush1.bf16.msra.mxu1 %v5646_v45  ;;  %v5729_v45 = vld [vmem:[#allocation5 + $0x744] ss:$8 sps:$4 sm:$0xff]   ;;  %v5724_v46 = vld [vmem:[#allocation5 + $0x9f0] ss:$8 sps:$4 sm:$0xff]  }
 0x146   :  { %2412 = vmatprep.mubr.bf16.mxu1 %v6340_v1  ;;  %3025 = vmatprep.subr.bf16.mxu1 %v5654_v47  ;;  %v5727_v47 = vld [vmem:[#allocation5 + $0x740] ss:$8 sps:$4 sm:$0xff]  }
 0x148   :  { %2268 = vmatpush1.bf16.msra.mxu0 %v5649_v48  ;;  %v5732_v48 = vld [vmem:[#allocation5 + $0xa04] ss:$8 sps:$4 sm:$0xff]  }
 0x149   :  { %2269 = vmatprep.subr.bf16.mxu0 %v5657_v49  ;;  %v5735_v49 = vld [vmem:[#allocation5 + $0x754] ss:$8 sps:$4 sm:$0xff]  }
 0x14b   :  { %v6500_v13 = vpop.f32.mrb[0].mxu1 }
 0x14c   :  { %4956 = vmatmul.mubr.msk.bf16.vlgmr.msra.gmra.mrb[8].mxu1 %vm719_vm0, %v6464_v11  ;;  %2270 = vmatpush1.bf16.msra.mxu0 %v5655_v51  ;;  %v6502_v15 = vpop.f32.mrb[1].mxu1  ;;  %v5733_v51 = vld [vmem:[#allocation5 + $0x750] ss:$8 sps:$4 sm:$0xff]  }
 0x14d   :  { %3026 = vmatpush1.bf16.msra.mxu1 %v5652_v50  ;;  %2271 = vmatprep.subr.bf16.mxu0 %v5663_v53  ;;  %v884_v16 = vpop.f32.mrb[2].mxu1  ;;  %v5730_v50 = vld [vmem:[#allocation5 + $0xa00] ss:$8 sps:$4 sm:$0xff]   ;;  %v5738_v53 = vld [vmem:[#allocation5 + $0xa14] ss:$8 sps:$4 sm:$0xff]  }
 0x14e   :  { %3027 = vmatprep.subr.bf16.mxu1 %v5660_v54  ;;  %3057 = vmatprep.mubr.bf16.mxu1 %v6468_v52  ;;  %v885_v20 = vpop.f32.mrb[3].mxu1  ;;  %v5741_v54 = vld [vmem:[#allocation5 + $0x764] ss:$8 sps:$4 sm:$0xff]   ;;  %v5769_v16 = vld [vmem:[#allocation5 + $0x7b0] ss:$8 sps:$4 sm:$0xff]  }
 0x14f   :  { %v5777_v20 = vld [vmem:[#allocation5 + $0x7c4] ss:$8 sps:$4 sm:$0xff]  }
 0x150   :  { %2272 = vmatpush1.bf16.msra.mxu0 %v5661_v56  ;;  %v5739_v56 = vld [vmem:[#allocation5 + $0x760] ss:$8 sps:$4 sm:$0xff]  }
 0x151   :  { %3028 = vmatpush1.bf16.msra.mxu1 %v5658_v55  ;;  %2273 = vmatprep.subr.bf16.mxu0 %v5669_v57  ;;  %v5736_v55 = vld [vmem:[#allocation5 + $0xa10] ss:$8 sps:$4 sm:$0xff]   ;;  %v5744_v57 = vld [vmem:[#allocation5 + $0xa24] ss:$8 sps:$4 sm:$0xff]  }
 0x152   :  { %3029 = vmatprep.subr.bf16.mxu1 %v5666_v58  ;;  %v5747_v58 = vld [vmem:[#allocation5 + $0x774] ss:$8 sps:$4 sm:$0xff]  }
 0x154   :  { %2274 = vmatpush1.bf16.msra.mxu0 %v5667_v60  ;;  %v5745_v60 = vld [vmem:[#allocation5 + $0x770] ss:$8 sps:$4 sm:$0xff]  }
 0x155   :  { %3030 = vmatpush1.bf16.msra.mxu1 %v5664_v59  ;;  %2275 = vmatprep.subr.bf16.mxu0 %v5675_v61  ;;  %v5742_v59 = vld [vmem:[#allocation5 + $0xa20] ss:$8 sps:$4 sm:$0xff]   ;;  %v5753_v61 = vld [vmem:[#allocation5 + $0x784] ss:$8 sps:$4 sm:$0xff]  }
 0x156   :  { %3031 = vmatprep.subr.bf16.mxu1 %v5672_v62  ;;  %v5750_v62 = vld [vmem:[#allocation5 + $0xa34] ss:$8 sps:$4 sm:$0xff]  }
 0x158   :  { %2276 = vmatpush1.bf16.msra.mxu0 %v5673_v0  ;;  %v5751_v0 = vld [vmem:[#allocation5 + $0x780] ss:$8 sps:$4 sm:$0xff]  }
 0x159   :  { %3032 = vmatpush1.bf16.msra.mxu1 %v5670_v63  ;;  %2277 = vmatprep.subr.bf16.mxu0 %v5681_v2  ;;  %v5748_v63 = vld [vmem:[#allocation5 + $0xa30] ss:$8 sps:$4 sm:$0xff]   ;;  %v5756_v2 = vld [vmem:[#allocation5 + $0xa44] ss:$8 sps:$4 sm:$0xff]  }
 0x15a   :  { %3033 = vmatprep.subr.bf16.mxu1 %v5678_v3  ;;  %v5759_v3 = vld [vmem:[#allocation5 + $0x794] ss:$8 sps:$4 sm:$0xff]  }
 0x15c   :  { %2278 = vmatpush1.bf16.msra.mxu0 %v5679_v5  ;;  %v5757_v5 = vld [vmem:[#allocation5 + $0x790] ss:$8 sps:$4 sm:$0xff]  }
 0x15d   :  { %3034 = vmatpush1.bf16.msra.mxu1 %v5676_v4  ;;  %2279 = vmatprep.subr.bf16.mxu0 %v5687_v6  ;;  %v5754_v4 = vld [vmem:[#allocation5 + $0xa40] ss:$8 sps:$4 sm:$0xff]   ;;  %v5762_v6 = vld [vmem:[#allocation5 + $0xa54] ss:$8 sps:$4 sm:$0xff]  }
 0x15e   :  { %3035 = vmatprep.subr.bf16.mxu1 %v5684_v7  ;;  %v5765_v7 = vld [vmem:[#allocation5 + $0x7a4] ss:$8 sps:$4 sm:$0xff]  }
 0x160   :  { %2280 = vmatpush1.bf16.msra.mxu0 %v5685_v9  ;;  %v5763_v9 = vld [vmem:[#allocation5 + $0x7a0] ss:$8 sps:$4 sm:$0xff]  }
 0x161   :  { %3036 = vmatpush1.bf16.msra.mxu1 %v5682_v8  ;;  %2281 = vmatprep.subr.bf16.mxu0 %v5693_v12  ;;  %v5760_v8 = vld [vmem:[#allocation5 + $0xa50] ss:$8 sps:$4 sm:$0xff]   ;;  %v5768_v12 = vld [vmem:[#allocation5 + $0xa64] ss:$8 sps:$4 sm:$0xff]  }
 0x162   :  { %3037 = vmatprep.subr.bf16.mxu1 %v5690_v14  ;;  %v5771_v14 = vld [vmem:[#allocation5 + $0x7b4] ss:$8 sps:$4 sm:$0xff]  }
 0x164   :  { %2282 = vmatpush1.bf16.msra.mxu0 %v5691_v18  ;;  %v5774_v18 = vld [vmem:[#allocation5 + $0xa74] ss:$8 sps:$4 sm:$0xff]  }
 0x165   :  { %3038 = vmatpush1.bf16.msra.mxu1 %v5688_v17  ;;  %2283 = vmatprep.subr.bf16.mxu0 %v5699_v21  ;;  %v5766_v17 = vld [vmem:[#allocation5 + $0xa60] ss:$8 sps:$4 sm:$0xff]   ;;  %v5772_v21 = vld [vmem:[#allocation5 + $0xa70] ss:$8 sps:$4 sm:$0xff]  }
 0x166   :  { %3039 = vmatprep.subr.bf16.mxu1 %v5696_v22  ;;  %v5775_v22 = vld [vmem:[#allocation5 + $0x7c0] ss:$8 sps:$4 sm:$0xff]  }
 0x168   :  { %2284 = vmatpush1.bf16.msra.mxu0 %v5697_v24  ;;  %v5783_v24 = vld [vmem:[#allocation5 + $0x7d4] ss:$8 sps:$4 sm:$0xff]  }
 0x169   :  { %3040 = vmatpush1.bf16.msra.mxu1 %v5694_v23  ;;  %2285 = vmatprep.subr.bf16.mxu0 %v5705_v26  ;;  %v5780_v23 = vld [vmem:[#allocation5 + $0xa84] ss:$8 sps:$4 sm:$0xff]   ;;  %v5778_v26 = vld [vmem:[#allocation5 + $0xa80] ss:$8 sps:$4 sm:$0xff]  }
 0x16a   :  { %3041 = vmatprep.subr.bf16.mxu1 %v5702_v27  ;;  %v5781_v27 = vld [vmem:[#allocation5 + $0x7d0] ss:$8 sps:$4 sm:$0xff]  }
 0x16c   :  { %2286 = vmatpush1.bf16.msra.mxu0 %v5703_v29  ;;  %v5789_v29 = vld [vmem:[#allocation5 + $0x7e4] ss:$8 sps:$4 sm:$0xff]  }
 0x16d   :  { %3042 = vmatpush1.bf16.msra.mxu1 %v5700_v28  ;;  %2287 = vmatprep.subr.bf16.mxu0 %v5711_v31  ;;  %v5786_v28 = vld [vmem:[#allocation5 + $0xa94] ss:$8 sps:$4 sm:$0xff]   ;;  %v5787_v31 = vld [vmem:[#allocation5 + $0x7e0] ss:$8 sps:$4 sm:$0xff]  }
 0x16e   :  { %3043 = vmatprep.subr.bf16.mxu1 %v5708_v32  ;;  %v5784_v32 = vld [vmem:[#allocation5 + $0xa90] ss:$8 sps:$4 sm:$0xff]  }
 0x170   :  { %2288 = vmatpush1.bf16.msra.mxu0 %v5709_v33  ;;  %v5792_v33 = vld [vmem:[#allocation5 + $0xaa4] ss:$8 sps:$4 sm:$0xff]  }
 0x171   :  { %3044 = vmatpush1.bf16.msra.mxu1 %v5706_v34  ;;  %2298 = vmatprep.subr.bf16.mxu0 %v5717_v35  ;;  %v5795_v34 = vld [vmem:[#allocation5 + $0x7f4] ss:$8 sps:$4 sm:$0xff]   ;;  %v5793_v35 = vld [vmem:[#allocation5 + $0x7f0] ss:$8 sps:$4 sm:$0xff]  }
 0x172   :  { %3045 = vmatprep.subr.bf16.mxu1 %v5714_v36  ;;  %v5790_v36 = vld [vmem:[#allocation5 + $0xaa0] ss:$8 sps:$4 sm:$0xff]  }
 0x173   :  { %2290 = vmatmul.mubr.bf16.vlgmr.msra.gmra.mrb[4].mxu0 %v6472_v10 }
 0x174   :  { %2299 = vmatpush1.bf16.msra.mxu0 %v5715_v38  ;;  %2330 = vmatprep.mubr.bf16.mxu0 %v6476_v37  ;;  %v5798_v38 = vld [vmem:[#allocation5 + $0xab4] ss:$8 sps:$4 sm:$0xff]  }
 0x175   :  { %3046 = vmatpush1.bf16.msra.mxu1 %v5712_v39  ;;  %2300 = vmatprep.subr.bf16.mxu0 %v5723_v41  ;;  %v5801_v39 = vld [vmem:[#allocation5 + $0x804] ss:$8 sps:$4 sm:$0xff]   ;;  %v5796_v41 = vld [vmem:[#allocation5 + $0xab0] ss:$8 sps:$4 sm:$0xff]  }
 0x176   :  { %3047 = vmatprep.subr.bf16.mxu1 %v5720_v40  ;;  %v5799_v40 = vld [vmem:[#allocation5 + $0x800] ss:$8 sps:$4 sm:$0xff]  }
 0x178   :  { %2301 = vmatpush1.bf16.msra.mxu0 %v5721_v43  ;;  %v5807_v43 = vld [vmem:[#allocation5 + $0x814] ss:$8 sps:$4 sm:$0xff]  }
 0x179   :  { %3048 = vmatpush1.bf16.msra.mxu1 %v5718_v42  ;;  %2302 = vmatprep.subr.bf16.mxu0 %v5729_v45  ;;  %v5804_v42 = vld [vmem:[#allocation5 + $0xac4] ss:$8 sps:$4 sm:$0xff]   ;;  %v5802_v45 = vld [vmem:[#allocation5 + $0xac0] ss:$8 sps:$4 sm:$0xff]  }
 0x17a   :  { %3049 = vmatprep.subr.bf16.mxu1 %v5726_v44  ;;  %v5805_v44 = vld [vmem:[#allocation5 + $0x810] ss:$8 sps:$4 sm:$0xff]  }
 0x17c   :  { %2303 = vmatpush1.bf16.msra.mxu0 %v5727_v47  ;;  %v5813_v47 = vld [vmem:[#allocation5 + $0x824] ss:$8 sps:$4 sm:$0xff]  }
 0x17d   :  { %3050 = vmatpush1.bf16.msra.mxu1 %v5724_v46  ;;  %2304 = vmatprep.subr.bf16.mxu0 %v5735_v49  ;;  %v5810_v46 = vld [vmem:[#allocation5 + $0xad4] ss:$8 sps:$4 sm:$0xff]   ;;  %v5808_v49 = vld [vmem:[#allocation5 + $0xad0] ss:$8 sps:$4 sm:$0xff]  }
 0x17e   :  { %3051 = vmatprep.subr.bf16.mxu1 %v5732_v48  ;;  %v5811_v48 = vld [vmem:[#allocation5 + $0x820] ss:$8 sps:$4 sm:$0xff]  }
 0x180   :  { %2305 = vmatpush1.bf16.msra.mxu0 %v5733_v51  ;;  %v5819_v51 = vld [vmem:[#allocation5 + $0x834] ss:$8 sps:$4 sm:$0xff]  }
 0x181   :  { %3052 = vmatpush1.bf16.msra.mxu1 %v5730_v50  ;;  %2306 = vmatprep.subr.bf16.mxu0 %v5741_v54  ;;  %v5816_v50 = vld [vmem:[#allocation5 + $0xae4] ss:$8 sps:$4 sm:$0xff]   ;;  %v5814_v54 = vld [vmem:[#allocation5 + $0xae0] ss:$8 sps:$4 sm:$0xff]  }
 0x182   :  { %3053 = vmatprep.subr.bf16.mxu1 %v5738_v53  ;;  %v5817_v53 = vld [vmem:[#allocation5 + $0x830] ss:$8 sps:$4 sm:$0xff]  }
 0x184   :  { %2307 = vmatpush1.bf16.msra.mxu0 %v5739_v56  ;;  %v5825_v56 = vld [vmem:[#allocation5 + $0x844] ss:$8 sps:$4 sm:$0xff]  }
 0x185   :  { %3054 = vmatpush1.bf16.msra.mxu1 %v5736_v55  ;;  %2308 = vmatprep.subr.bf16.mxu0 %v5747_v58  ;;  %v5822_v55 = vld [vmem:[#allocation5 + $0xaf4] ss:$8 sps:$4 sm:$0xff]   ;;  %v5820_v58 = vld [vmem:[#allocation5 + $0xaf0] ss:$8 sps:$4 sm:$0xff]  }
 0x186   :  { %3055 = vmatprep.subr.bf16.mxu1 %v5744_v57  ;;  %v5823_v57 = vld [vmem:[#allocation5 + $0x840] ss:$8 sps:$4 sm:$0xff]  }
 0x188   :  { %2309 = vmatpush1.bf16.msra.mxu0 %v5745_v60  ;;  %v5831_v60 = vld [vmem:[#allocation5 + $0x854] ss:$8 sps:$4 sm:$0xff]  }
 0x189   :  { %3056 = vmatpush1.bf16.msra.mxu1 %v5742_v59  ;;  %2310 = vmatprep.subr.bf16.mxu0 %v5753_v61  ;;  %v5828_v59 = vld [vmem:[#allocation5 + $0xb04] ss:$8 sps:$4 sm:$0xff]   ;;  %v5829_v61 = vld [vmem:[#allocation5 + $0x850] ss:$8 sps:$4 sm:$0xff]  }
 0x18a   :  { %3066 = vmatprep.subr.bf16.mxu1 %v5750_v62  ;;  %v5826_v62 = vld [vmem:[#allocation5 + $0xb00] ss:$8 sps:$4 sm:$0xff]  }
 0x18c   :  { %3058 = vmatmul.mubr.bf16.vlgmr.msra.gmra.mrb[12].mxu1 %v6472_v10  ;;  %2311 = vmatpush1.bf16.msra.mxu0 %v5751_v0  ;;  %v5837_v0 = vld [vmem:[#allocation5 + $0x864] ss:$8 sps:$4 sm:$0xff]  }
 0x18d   :  { %3067 = vmatpush1.bf16.msra.mxu1 %v5748_v63  ;;  %2312 = vmatprep.subr.bf16.mxu0 %v5759_v3  ;;  %v5834_v63 = vld [vmem:[#allocation5 + $0xb14] ss:$8 sps:$4 sm:$0xff]   ;;  %v5832_v3 = vld [vmem:[#allocation5 + $0xb10] ss:$8 sps:$4 sm:$0xff]  }
 0x18e   :  { %3068 = vmatprep.subr.bf16.mxu1 %v5756_v2  ;;  %3098 = vmatprep.mubr.bf16.mxu1 %v6476_v37  ;;  %v5835_v2 = vld [vmem:[#allocation5 + $0x860] ss:$8 sps:$4 sm:$0xff]  }
 0x190   :  { %2313 = vmatpush1.bf16.msra.mxu0 %v5757_v5  ;;  %v5843_v5 = vld [vmem:[#allocation5 + $0x874] ss:$8 sps:$4 sm:$0xff]  }
 0x191   :  { %3069 = vmatpush1.bf16.msra.mxu1 %v5754_v4  ;;  %2314 = vmatprep.subr.bf16.mxu0 %v5765_v7  ;;  %v5840_v4 = vld [vmem:[#allocation5 + $0xb24] ss:$8 sps:$4 sm:$0xff]   ;;  %v5838_v7 = vld [vmem:[#allocation5 + $0xb20] ss:$8 sps:$4 sm:$0xff]  }
 0x192   :  { %3070 = vmatprep.subr.bf16.mxu1 %v5762_v6  ;;  %v5841_v6 = vld [vmem:[#allocation5 + $0x870] ss:$8 sps:$4 sm:$0xff]  }
 0x194   :  { %2315 = vmatpush1.bf16.msra.mxu0 %v5763_v9  ;;  %v5849_v9 = vld [vmem:[#allocation5 + $0x884] ss:$8 sps:$4 sm:$0xff]  }
 0x195   :  { %3071 = vmatpush1.bf16.msra.mxu1 %v5760_v8  ;;  %2316 = vmatprep.subr.bf16.mxu0 %v5771_v14  ;;  %v5846_v8 = vld [vmem:[#allocation5 + $0xb34] ss:$8 sps:$4 sm:$0xff]   ;;  %v5844_v14 = vld [vmem:[#allocation5 + $0xb30] ss:$8 sps:$4 sm:$0xff]  }
 0x196   :  { %3072 = vmatprep.subr.bf16.mxu1 %v5768_v12  ;;  %v5847_v12 = vld [vmem:[#allocation5 + $0x880] ss:$8 sps:$4 sm:$0xff]  }
 0x198   :  { %2317 = vmatpush1.bf16.msra.mxu0 %v5769_v16  ;;  %v5855_v16 = vld [vmem:[#allocation5 + $0x894] ss:$8 sps:$4 sm:$0xff]  }
 0x199   :  { %3073 = vmatpush1.bf16.msra.mxu1 %v5766_v17  ;;  %2318 = vmatprep.subr.bf16.mxu0 %v5777_v20  ;;  %v5852_v17 = vld [vmem:[#allocation5 + $0xb44] ss:$8 sps:$4 sm:$0xff]   ;;  %v5850_v20 = vld [vmem:[#allocation5 + $0xb40] ss:$8 sps:$4 sm:$0xff]  }
 0x19a   :  { %3074 = vmatprep.subr.bf16.mxu1 %v5774_v18  ;;  %v5853_v18 = vld [vmem:[#allocation5 + $0x890] ss:$8 sps:$4 sm:$0xff]  }
 0x19c   :  { %2319 = vmatpush1.bf16.msra.mxu0 %v5775_v22  ;;  %v5858_v22 = vld [vmem:[#allocation5 + $0xb54] ss:$8 sps:$4 sm:$0xff]  }
 0x19d   :  { %3075 = vmatpush1.bf16.msra.mxu1 %v5772_v21  ;;  %2320 = vmatprep.subr.bf16.mxu0 %v5783_v24  ;;  %v5861_v21 = vld [vmem:[#allocation5 + $0x8a4] ss:$8 sps:$4 sm:$0xff]   ;;  %v5856_v24 = vld [vmem:[#allocation5 + $0xb50] ss:$8 sps:$4 sm:$0xff]  }
 0x19e   :  { %3076 = vmatprep.subr.bf16.mxu1 %v5780_v23  ;;  %v5859_v23 = vld [vmem:[#allocation5 + $0x8a0] ss:$8 sps:$4 sm:$0xff]  }
 0x1a0   :  { %2321 = vmatpush1.bf16.msra.mxu0 %v5781_v27  ;;  %v5864_v27 = vld [vmem:[#allocation5 + $0xb64] ss:$8 sps:$4 sm:$0xff]  }
 0x1a1   :  { %3077 = vmatpush1.bf16.msra.mxu1 %v5778_v26  ;;  %2322 = vmatprep.subr.bf16.mxu0 %v5789_v29  ;;  %v5867_v26 = vld [vmem:[#allocation5 + $0x8b4] ss:$8 sps:$4 sm:$0xff]   ;;  %v5862_v29 = vld [vmem:[#allocation5 + $0xb60] ss:$8 sps:$4 sm:$0xff]  }
 0x1a2   :  { %3078 = vmatprep.subr.bf16.mxu1 %v5786_v28  ;;  %v5865_v28 = vld [vmem:[#allocation5 + $0x8b0] ss:$8 sps:$4 sm:$0xff]  }
 0x1a4   :  { %2323 = vmatpush1.bf16.msra.mxu0 %v5787_v31  ;;  %v5873_v31 = vld [vmem:[#allocation5 + $0x8c4] ss:$8 sps:$4 sm:$0xff]  }
 0x1a5   :  { %3079 = vmatpush1.bf16.msra.mxu1 %v5784_v32  ;;  %2324 = vmatprep.subr.bf16.mxu0 %v5795_v34  ;;  %v5870_v32 = vld [vmem:[#allocation5 + $0xb74] ss:$8 sps:$4 sm:$0xff]   ;;  %v5868_v34 = vld [vmem:[#allocation5 + $0xb70] ss:$8 sps:$4 sm:$0xff]  }
 0x1a6   :  { %3080 = vmatprep.subr.bf16.mxu1 %v5792_v33  ;;  %v5871_v33 = vld [vmem:[#allocation5 + $0x8c0] ss:$8 sps:$4 sm:$0xff]  }
 0x1a8   :  { %2325 = vmatpush1.bf16.msra.mxu0 %v5793_v35  ;;  %v5879_v35 = vld [vmem:[#allocation5 + $0x8d4] ss:$8 sps:$4 sm:$0xff]  }
 0x1a9   :  { %3081 = vmatpush1.bf16.msra.mxu1 %v5790_v36  ;;  %2326 = vmatprep.subr.bf16.mxu0 %v5801_v39  ;;  %v5876_v36 = vld [vmem:[#allocation5 + $0xb84] ss:$8 sps:$4 sm:$0xff]   ;;  %v5874_v39 = vld [vmem:[#allocation5 + $0xb80] ss:$8 sps:$4 sm:$0xff]  }
 0x1aa   :  { %3082 = vmatprep.subr.bf16.mxu1 %v5798_v38  ;;  %v5877_v38 = vld [vmem:[#allocation5 + $0x8d0] ss:$8 sps:$4 sm:$0xff]  }
 0x1ac   :  { %2327 = vmatpush1.bf16.msra.mxu0 %v5799_v40  ;;  %v5885_v40 = vld [vmem:[#allocation5 + $0x8e4] ss:$8 sps:$4 sm:$0xff]  }
 0x1ad   :  { %3083 = vmatpush1.bf16.msra.mxu1 %v5796_v41  ;;  %2328 = vmatprep.subr.bf16.mxu0 %v5807_v43  ;;  %v5882_v41 = vld [vmem:[#allocation5 + $0xb94] ss:$8 sps:$4 sm:$0xff]   ;;  %v5880_v43 = vld [vmem:[#allocation5 + $0xb90] ss:$8 sps:$4 sm:$0xff]  }
 0x1ae   :  { %3084 = vmatprep.subr.bf16.mxu1 %v5804_v42  ;;  %v5883_v42 = vld [vmem:[#allocation5 + $0x8e0] ss:$8 sps:$4 sm:$0xff]  }
 0x1b0   :  { %2329 = vmatpush1.bf16.msra.mxu0 %v5805_v44  ;;  %v5891_v44 = vld [vmem:[#allocation5 + $0x8f4] ss:$8 sps:$4 sm:$0xff]  }
 0x1b1   :  { %3085 = vmatpush1.bf16.msra.mxu1 %v5802_v45  ;;  %2339 = vmatprep.subr.bf16.mxu0 %v5813_v47  ;;  %v5888_v45 = vld [vmem:[#allocation5 + $0xba4] ss:$8 sps:$4 sm:$0xff]   ;;  %v5886_v47 = vld [vmem:[#allocation5 + $0xba0] ss:$8 sps:$4 sm:$0xff]  }
 0x1b2   :  { %3086 = vmatprep.subr.bf16.mxu1 %v5810_v46  ;;  %v5889_v46 = vld [vmem:[#allocation5 + $0x8f0] ss:$8 sps:$4 sm:$0xff]  }
 0x1b3   :  { %2331 = vmatmul.mubr.bf16.vlgmr.msra.gmra.mrb[4].mxu0 %v6480_v19 }
 0x1b4   :  { %2340 = vmatpush1.bf16.msra.mxu0 %v5811_v48  ;;  %2371 = vmatprep.mubr.bf16.mxu0 %v6482_v25  ;;  %v5897_v48 = vld [vmem:[#allocation5 + $0x904] ss:$8 sps:$4 sm:$0xff]  }
 0x1b5   :  { %3087 = vmatpush1.bf16.msra.mxu1 %v5808_v49  ;;  %2341 = vmatprep.subr.bf16.mxu0 %v5819_v51  ;;  %v5894_v49 = vld [vmem:[#allocation5 + $0xbb4] ss:$8 sps:$4 sm:$0xff]   ;;  %v5892_v51 = vld [vmem:[#allocation5 + $0xbb0] ss:$8 sps:$4 sm:$0xff]  }
 0x1b6   :  { %3088 = vmatprep.subr.bf16.mxu1 %v5816_v50  ;;  %v5895_v50 = vld [vmem:[#allocation5 + $0x900] ss:$8 sps:$4 sm:$0xff]  }
 0x1b8   :  { %2342 = vmatpush1.bf16.msra.mxu0 %v5817_v53  ;;  %v5903_v53 = vld [vmem:[#allocation5 + $0x914] ss:$8 sps:$4 sm:$0xff]  }
 0x1b9   :  { %3089 = vmatpush1.bf16.msra.mxu1 %v5814_v54  ;;  %2343 = vmatprep.subr.bf16.mxu0 %v5825_v56  ;;  %v5900_v54 = vld [vmem:[#allocation5 + $0xbc4] ss:$8 sps:$4 sm:$0xff]   ;;  %v5898_v56 = vld [vmem:[#allocation5 + $0xbc0] ss:$8 sps:$4 sm:$0xff]  }
 0x1ba   :  { %3090 = vmatprep.subr.bf16.mxu1 %v5822_v55  ;;  %v5901_v55 = vld [vmem:[#allocation5 + $0x910] ss:$8 sps:$4 sm:$0xff]  }
 0x1bc   :  { %2344 = vmatpush1.bf16.msra.mxu0 %v5823_v57  ;;  %v5909_v57 = vld [vmem:[#allocation5 + $0xc44] ss:$8 sps:$4 sm:$0xff]  }
 0x1bd   :  { %3091 = vmatpush1.bf16.msra.mxu1 %v5820_v58  ;;  %2345 = vmatprep.subr.bf16.mxu0 %v5831_v60  ;;  %v5906_v58 = vld [vmem:[#allocation5 + $0xbd4] ss:$8 sps:$4 sm:$0xff]   ;;  %v5904_v60 = vld [vmem:[#allocation5 + $0xbd0] ss:$8 sps:$4 sm:$0xff]  }
 0x1be   :  { %3092 = vmatprep.subr.bf16.mxu1 %v5828_v59  ;;  %v5907_v59 = vld [vmem:[#allocation5 + $0xc40] ss:$8 sps:$4 sm:$0xff]  }
 0x1c0   :  { %2346 = vmatpush1.bf16.msra.mxu0 %v5829_v61  ;;  %v5915_v61 = vld [vmem:[#allocation5 + $0xc54] ss:$8 sps:$4 sm:$0xff]  }
 0x1c1   :  { %3093 = vmatpush1.bf16.msra.mxu1 %v5826_v62  ;;  %2347 = vmatprep.subr.bf16.mxu0 %v5837_v0  ;;  %v5912_v62 = vld [vmem:[#allocation5 + $0xbe4] ss:$8 sps:$4 sm:$0xff]   ;;  %v5910_v0 = vld [vmem:[#allocation5 + $0xbe0] ss:$8 sps:$4 sm:$0xff]  }
 0x1c2   :  { %3094 = vmatprep.subr.bf16.mxu1 %v5834_v63  ;;  %v5913_v63 = vld [vmem:[#allocation5 + $0xc50] ss:$8 sps:$4 sm:$0xff]  }
 0x1c4   :  { %2348 = vmatpush1.bf16.msra.mxu0 %v5835_v2  ;;  %v5921_v2 = vld [vmem:[#allocation5 + $0xc64] ss:$8 sps:$4 sm:$0xff]  }
 0x1c5   :  { %3095 = vmatpush1.bf16.msra.mxu1 %v5832_v3  ;;  %2349 = vmatprep.subr.bf16.mxu0 %v5843_v5  ;;  %v5918_v3 = vld [vmem:[#allocation5 + $0xbf4] ss:$8 sps:$4 sm:$0xff]   ;;  %v5919_v5 = vld [vmem:[#allocation5 + $0xc60] ss:$8 sps:$4 sm:$0xff]  }
 0x1c6   :  { %3096 = vmatprep.subr.bf16.mxu1 %v5840_v4  ;;  %v219_v4 = vlaneseq }
 0x1c8   :  { %2350 = vmatpush1.bf16.msra.mxu0 %v5841_v6  ;;  %v5916_v6 = vld [vmem:[#allocation5 + $0xbf0] ss:$8 sps:$4 sm:$0xff]  }
 0x1c9   :  { %3097 = vmatpush1.bf16.msra.mxu1 %v5838_v7  ;;  %2351 = vmatprep.subr.bf16.mxu0 %v5849_v9  ;;  %v5927_v7 = vld [vmem:[#allocation5 + $0xc74] ss:$8 sps:$4 sm:$0xff]   ;;  %v6514_v9 = vshrl.u32 %v219_v4, 7  ;;  %v5964_v4 = vld [vmem:[#allocation5 + $0xd10] ss:$8 sps:$4 sm:$0xff]  }
 0x1ca   :  { %3107 = vmatprep.subr.bf16.mxu1 %v5846_v8  ;;  %v5924_v8 = vld [vmem:[#allocation5 + $0xc04] ss:$8 sps:$4 sm:$0xff]  }
 0x1cc   :  { %3099 = vmatmul.mubr.bf16.vlgmr.msra.gmra.mrb[12].mxu1 %v6480_v19  ;;  %2352 = vmatpush1.bf16.msra.mxu0 %v5847_v12  ;;  %v5925_v12 = vld [vmem:[#allocation5 + $0xc70] ss:$8 sps:$4 sm:$0xff]  }
 0x1cd   :  { %3108 = vmatpush1.bf16.msra.mxu1 %v5844_v14  ;;  %2353 = vmatprep.subr.bf16.mxu0 %v5855_v16  ;;  %v5933_v14 = vld [vmem:[#allocation5 + $0xc84] ss:$8 sps:$4 sm:$0xff]   ;;  %v5930_v16 = vld [vmem:[#allocation5 + $0xc14] ss:$8 sps:$4 sm:$0xff]  }
 0x1ce   :  { %3109 = vmatprep.subr.bf16.mxu1 %v5852_v17  ;;  %3139 = vmatprep.mubr.bf16.mxu1 %v6482_v25  ;;  %v6517_v17 = vsub.s32 0, %v6514_v9 }
 0x1d0   :  { %2354 = vmatpush1.bf16.msra.mxu0 %v5853_v18  ;;  %v5931_v18 = vld [vmem:[#allocation5 + $0xc80] ss:$8 sps:$4 sm:$0xff]  }
 0x1d1   :  { %3110 = vmatpush1.bf16.msra.mxu1 %v5850_v20  ;;  %2355 = vmatprep.subr.bf16.mxu0 %v5861_v21  ;;  %v217_v20 = vld [vmem:[#allocation7] sm:$0x3]  ;;  %v6520_v21 = vsub.s32 1, %v6514_v9 }
 0x1d2   :  { %3111 = vmatprep.subr.bf16.mxu1 %v5858_v22  ;;  %v5928_v22 = vld [vmem:[#allocation5 + $0xc10] ss:$8 sps:$4 sm:$0xff]  }
 0x1d4   :  { %2356 = vmatpush1.bf16.msra.mxu0 %v5859_v23  ;;  %v5939_v23 = vld [vmem:[#allocation5 + $0xc94] ss:$8 sps:$4 sm:$0xff]  }
 0x1d5   :  { %3112 = vmatpush1.bf16.msra.mxu1 %v5856_v24  ;;  %2357 = vmatprep.subr.bf16.mxu0 %v5867_v26  ;;  %v5936_v24 = vld [vmem:[#allocation5 + $0xc24] ss:$8 sps:$4 sm:$0xff]   ;;  %v222_v26 = vrot.slane %v217_v20, %v6517_v17 }
 0x1d6   :  { %3113 = vmatprep.subr.bf16.mxu1 %v5864_v27  ;;  %v226_v27 = vrot.slane %v217_v20, %v6520_v21 }
 0x1d8   :  { %2358 = vmatpush1.bf16.msra.mxu0 %v5865_v28  ;;  %v5937_v28 = vld [vmem:[#allocation5 + $0xc90] ss:$8 sps:$4 sm:$0xff]  }
 0x1d9   :  { %3114 = vmatpush1.bf16.msra.mxu1 %v5862_v29  ;;  %2359 = vmatprep.subr.bf16.mxu0 %v5873_v31  ;;  %v5934_v29 = vld [vmem:[#allocation5 + $0xc20] ss:$8 sps:$4 sm:$0xff]   ;;  %v5942_v31 = vld [vmem:[#allocation5 + $0xca4] ss:$8 sps:$4 sm:$0xff]  }
 0x1da   :  { %3115 = vmatprep.subr.bf16.mxu1 %v5870_v32 }
 0x1dc   :  { %2360 = vmatpush1.bf16.msra.mxu0 %v5871_v33  ;;  %v5948_v33 = vld [vmem:[#allocation5 + $0xc34] ss:$8 sps:$4 sm:$0xff]  }
 0x1dd   :  { %3116 = vmatpush1.bf16.msra.mxu1 %v5868_v34  ;;  %2361 = vmatprep.subr.bf16.mxu0 %v5879_v35 }
 0x1de   :  { %3117 = vmatprep.subr.bf16.mxu1 %v5876_v36 }
 0x1e0   :  { %2362 = vmatpush1.bf16.msra.mxu0 %v5877_v38 }
 0x1e1   :  { %3118 = vmatpush1.bf16.msra.mxu1 %v5874_v39  ;;  %2363 = vmatprep.subr.bf16.mxu0 %v5885_v40  ;;  %v5940_v39 = vld [vmem:[#allocation5 + $0xca0] ss:$8 sps:$4 sm:$0xff]  }
 0x1e2   :  { %3119 = vmatprep.subr.bf16.mxu1 %v5882_v41 }
 0x1e4   :  { %2364 = vmatpush1.bf16.msra.mxu0 %v5883_v42  ;;  %v5945_v42 = vld [vmem:[#allocation5 + $0xcb4] ss:$8 sps:$4 sm:$0xff]  }
 0x1e5   :  { %3120 = vmatpush1.bf16.msra.mxu1 %v5880_v43  ;;  %2365 = vmatprep.subr.bf16.mxu0 %v5891_v44  ;;  %v5946_v43 = vld [vmem:[#allocation5 + $0xc30] ss:$8 sps:$4 sm:$0xff]  }
 0x1e6   :  { %3121 = vmatprep.subr.bf16.mxu1 %v5888_v45  ;;  %v5943_v45 = vld [vmem:[#allocation5 + $0xcb0] ss:$8 sps:$4 sm:$0xff]  }
 0x1e8   :  { %2366 = vmatpush1.bf16.msra.mxu0 %v5889_v46  ;;  %v5951_v46 = vld [vmem:[#allocation5 + $0xcc4] ss:$8 sps:$4 sm:$0xff]  }
 0x1e9   :  { %3122 = vmatpush1.bf16.msra.mxu1 %v5886_v47  ;;  %2367 = vmatprep.subr.bf16.mxu0 %v5897_v48  ;;  %v987_v47 = vld [vmem:[#allocation7 + $0x2] sm:$0x3]  ;;  %v5954_v48 = vld [vmem:[#allocation5 + $0xcd4] ss:$8 sps:$4 sm:$0xff]  }
 0x1ea   :  { %3123 = vmatprep.subr.bf16.mxu1 %v5894_v49  ;;  %v992_v49 = vrot.slane %v987_v47, %v6517_v17 }
 0x1ec   :  { %2368 = vmatpush1.bf16.msra.mxu0 %v5895_v50  ;;  %v996_v50 = vrot.slane %v987_v47, %v6520_v21  ;;  %v6009_v47 = vld [vmem:[#allocation5 + $0xe00] ss:$8 sps:$4 sm:$0xff]  }
 0x1ed   :  { %3124 = vmatpush1.bf16.msra.mxu1 %v5892_v51  ;;  %2369 = vmatprep.subr.bf16.mxu0 %v5903_v53  ;;  %v5957_v51 = vld [vmem:[#allocation5 + $0xce4] ss:$8 sps:$4 sm:$0xff]  }
 0x1ee   :  { %3125 = vmatprep.subr.bf16.mxu1 %v5900_v54 }
 0x1f0   :  { %2370 = vmatpush1.bf16.msra.mxu0 %v5901_v55 }
 0x1f1   :  { %3126 = vmatpush1.bf16.msra.mxu1 %v5898_v56  ;;  %3793 = vmatprep.subr.bf16.mxu0 %v5909_v57  ;;  %v5955_v56 = vld [vmem:[#allocation5 + $0xce0] ss:$8 sps:$4 sm:$0xff]  }
 0x1f2   :  { %3127 = vmatprep.subr.bf16.mxu1 %v5906_v58  ;;  %v5960_v58 = vld [vmem:[#allocation5 + $0xcf4] ss:$8 sps:$4 sm:$0xff]  }
 0x1f3   :  { %2372 = vmatmul.mubr.bf16.vlgmr.msra.gmra.mrb[4].mxu0 %v6488_v30 }
 0x1f4   :  { %3794 = vmatpush1.bf16.msra.mxu0 %v5907_v59  ;;  %3825 = vmatprep.mubr.bf16.mxu0 %v6468_v52  ;;  %v5922_v52 = vld [vmem:[#allocation5 + $0xc00] ss:$8 sps:$4 sm:$0xff]  }
 0x1f5   :  { %3128 = vmatpush1.bf16.msra.mxu1 %v5904_v60  ;;  %3795 = vmatprep.subr.bf16.mxu0 %v5915_v61 }
 0x1f6   :  { %3129 = vmatprep.subr.bf16.mxu1 %v5912_v62 }
 0x1f8   :  { %3796 = vmatpush1.bf16.msra.mxu0 %v5913_v63  ;;  %v5958_v63 = vld [vmem:[#allocation5 + $0xcf0] ss:$8 sps:$4 sm:$0xff]  }
 0x1f9   :  { %3130 = vmatpush1.bf16.msra.mxu1 %v5910_v0  ;;  %3797 = vmatprep.subr.bf16.mxu0 %v5921_v2  ;;  %v5963_v0 = vld [vmem:[#allocation5 + $0xd04] ss:$8 sps:$4 sm:$0xff]   ;;  %v5961_v2 = vld [vmem:[#allocation5 + $0xd00] ss:$8 sps:$4 sm:$0xff]  }
 0x1fa   :  { %3131 = vmatprep.subr.bf16.mxu1 %v5918_v3  ;;  %v5966_v3 = vld [vmem:[#allocation5 + $0xd14] ss:$8 sps:$4 sm:$0xff]  }
 0x1fc   :  { %3798 = vmatpush1.bf16.msra.mxu0 %v5919_v5  ;;  %v5969_v5 = vld [vmem:[#allocation5 + $0xd24] ss:$8 sps:$4 sm:$0xff]  }
 0x1fd   :  { %3132 = vmatpush1.bf16.msra.mxu1 %v5916_v6  ;;  %3799 = vmatprep.subr.bf16.mxu0 %v5927_v7  ;;  %v5972_v6 = vld [vmem:[#allocation5 + $0xd34] ss:$8 sps:$4 sm:$0xff]   ;;  %v5970_v7 = vld [vmem:[#allocation5 + $0xd30] ss:$8 sps:$4 sm:$0xff]  }
 0x1fe   :  { %3133 = vmatprep.subr.bf16.mxu1 %v5924_v8  ;;  %v6066_v8 = vld [vmem:[#allocation5 + $0xf40] ss:$8 sps:$4 sm:$0xff]  }
 0x200   :  { %3800 = vmatpush1.bf16.msra.mxu0 %v5925_v12  ;;  %v6068_v12 = vld [vmem:[#allocation5 + $0xf44] ss:$8 sps:$4 sm:$0xff]  }
 0x201   :  { %3134 = vmatpush1.bf16.msra.mxu1 %v5922_v52  ;;  %3801 = vmatprep.subr.bf16.mxu0 %v5933_v14  ;;  %v5975_v52 = vld [vmem:[#allocation5 + $0xd44] ss:$8 sps:$4 sm:$0xff]   ;;  %v5973_v14 = vld [vmem:[#allocation5 + $0xd40] ss:$8 sps:$4 sm:$0xff]  }
 0x202   :  { %3135 = vmatprep.subr.bf16.mxu1 %v5930_v16 }
 0x204   :  { %3802 = vmatpush1.bf16.msra.mxu0 %v5931_v18  ;;  %v5978_v18 = vld [vmem:[#allocation5 + $0xd54] ss:$8 sps:$4 sm:$0xff]  }
 0x205   :  { %3136 = vmatpush1.bf16.msra.mxu1 %v5928_v22  ;;  %3803 = vmatprep.subr.bf16.mxu0 %v5939_v23 }
 0x206   :  { %v839_v32 = vpop.f32.mrb[0].mxu0  ;;  %3137 = vmatprep.subr.bf16.mxu1 %v5936_v24  ;;  %v5976_v24 = vld [vmem:[#allocation5 + $0xd50] ss:$8 sps:$4 sm:$0xff]  }
 0x207   :  { %v5260_v34 = vadd.f32 %v839_v32, %v222_v26  ;;  %v841_v35 = vpop.f32.mrb[1].mxu0  ;;  %v5981_v26 = vld [vmem:[#allocation5 + $0xd64] ss:$8 sps:$4 sm:$0xff]   ;;  %v5990_v32 = vld [vmem:[#allocation5 + $0xd94] ss:$8 sps:$4 sm:$0xff]  }
 0x208   :  { %v5262_v36 = vadd.f32 %v841_v35, %v226_v27  ;;  %v843_v38 = vpop.f32.mrb[2].mxu0  ;;  %3804 = vmatpush1.bf16.msra.mxu0 %v5937_v28  ;;  %v5979_v27 = vld [vmem:[#allocation5 + $0xd60] ss:$8 sps:$4 sm:$0xff]   ;;  %v5984_v28 = vld [vmem:[#allocation5 + $0xd74] ss:$8 sps:$4 sm:$0xff]  }
 0x209   :  { %v6525_v40 = vadd.f32 %v5260_v34, %v6500_v13  ;;  %3138 = vmatpush1.bf16.msra.mxu1 %v5934_v29  ;;  %v844_v41 = vpop.f32.mrb[3].mxu0  ;;  %3805 = vmatprep.subr.bf16.mxu0 %v5942_v31  ;;  %v5949_v13 = vld [vmem:[#allocation5 + $0xcc0] ss:$8 sps:$4 sm:$0xff]   ;;  %v5982_v29 = vld [vmem:[#allocation5 + $0xd70] ss:$8 sps:$4 sm:$0xff]  }
 0x20a   :  { %v6528_v44 = vadd.f32 %v5262_v36, %v6502_v15  ;;  %3148 = vmatprep.subr.bf16.mxu1 %v5948_v33  ;;  %v5952_v15 = vld [vmem:[#allocation5 + $0xcd0] ss:$8 sps:$4 sm:$0xff]   ;;  %v5987_v31 = vld [vmem:[#allocation5 + $0xd84] ss:$8 sps:$4 sm:$0xff]   ;;  %v5996_v34 = vld [vmem:[#allocation5 + $0xdb4] ss:$8 sps:$4 sm:$0xff]  }
 0x20b   :  { %v5993_v33 = vld [vmem:[#allocation5 + $0xda4] ss:$8 sps:$4 sm:$0xff]   ;;  %v5994_v35 = vld [vmem:[#allocation5 + $0xdb0] ss:$8 sps:$4 sm:$0xff]   ;;  %v5997_v38 = vld [vmem:[#allocation5 + $0xdc0] ss:$8 sps:$4 sm:$0xff]  }
 0x20c   :  { %3140 = vmatmul.mubr.bf16.vlgmr.msra.gmra.mrb[12].mxu1 %v6488_v30  ;;  %3806 = vmatpush1.bf16.msra.mxu0 %v5940_v39  ;;  %v5999_v36 = vld [vmem:[#allocation5 + $0xdc4] ss:$8 sps:$4 sm:$0xff]   ;;  %v6002_v39 = vld [vmem:[#allocation5 + $0xdd4] ss:$8 sps:$4 sm:$0xff]   ;;  %v6000_v41 = vld [vmem:[#allocation5 + $0xdd0] ss:$8 sps:$4 sm:$0xff]  }
 0x20d   :  { %3807 = vmatprep.subr.bf16.mxu0 %v5945_v42  ;;  %3149 = vmatpush1.bf16.msra.mxu1 %v5946_v43  ;;  %v6005_v42 = vld [vmem:[#allocation5 + $0xde4] ss:$8 sps:$4 sm:$0xff]   ;;  %v6003_v43 = vld [vmem:[#allocation5 + $0xde0] ss:$8 sps:$4 sm:$0xff]  }
 0x20e   :  { %3180 = vmatprep.mubr.bf16.mxu1 %v6340_v1  ;;  %3916 = vmatprep.subr.bf16.mxu1 %v6068_v12  ;;  %v6030_v12 = vld [vmem:[#allocation5 + $0xe70] ss:$8 sps:$4 sm:$0xff]  }
 0x210   :  { %3808 = vmatpush1.bf16.msra.mxu0 %v5943_v45  ;;  %v6008_v45 = vld [vmem:[#allocation5 + $0xdf4] ss:$8 sps:$4 sm:$0xff]  }
 0x211   :  { %3809 = vmatprep.subr.bf16.mxu0 %v5951_v46  ;;  %v6006_v46 = vld [vmem:[#allocation5 + $0xdf0] ss:$8 sps:$4 sm:$0xff]  }
 0x214   :  { %3810 = vmatpush1.bf16.msra.mxu0 %v5949_v13  ;;  %v6011_v13 = vld [vmem:[#allocation5 + $0xe04] ss:$8 sps:$4 sm:$0xff]  }
 0x215   :  { %3811 = vmatprep.subr.bf16.mxu0 %v5954_v48  ;;  %v6014_v48 = vld [vmem:[#allocation5 + $0xe14] ss:$8 sps:$4 sm:$0xff]  }
 0x217   :  { %v1646_v53 = vpop.f32.mrb[4].mxu1 }
 0x218   :  { %v6534_v54 = vadd.f32 %v1646_v53, %v992_v49  ;;  %5055 = vmatmul.mubr.msk.bf16.vlgmr.msra.gmra.mrb[12].mxu1 %vm719_vm0, %v6464_v11  ;;  %v1648_v55 = vpop.f32.mrb[5].mxu1  ;;  %3812 = vmatpush1.bf16.msra.mxu0 %v5952_v15  ;;  %v6012_v49 = vld [vmem:[#allocation5 + $0xe10] ss:$8 sps:$4 sm:$0xff]   ;;  %v6017_v15 = vld [vmem:[#allocation5 + $0xe24] ss:$8 sps:$4 sm:$0xff]  }
 0x219   :  { %v6538_v57 = vadd.f32 %v1648_v55, %v996_v50  ;;  %3813 = vmatprep.subr.bf16.mxu0 %v5957_v51  ;;  %v1650_v59 = vpop.f32.mrb[6].mxu1  ;;  %3948 = vmatprep.mubr.bf16.mxu1 %v6340_v1  ;;  %v5967_v1 = vld [vmem:[#allocation5 + $0xd20] ss:$8 sps:$4 sm:$0xff]   ;;  %v6020_v51 = vld [vmem:[#allocation5 + $0xe34] ss:$8 sps:$4 sm:$0xff]  }
 0x21a   :  { %v1653_v60 = vmax.f32 %v6525_v40, %v6534_v54  ;;  %v1651_v61 = vpop.f32.mrb[7].mxu1  ;;  %3917 = vmatpush1.bf16.msra.mxu1 %v6066_v8  ;;  %v6015_v50 = vld [vmem:[#allocation5 + $0xe20] ss:$8 sps:$4 sm:$0xff]   ;;  %v6018_v53 = vld [vmem:[#allocation5 + $0xe30] ss:$8 sps:$4 sm:$0xff]  }
 0x21b   :  { %v1654_v62 = vmax.f32 %v6528_v44, %v6538_v57  ;;  %v6023_v55 = vld [vmem:[#allocation5 + $0xe44] ss:$8 sps:$4 sm:$0xff]   ;;  %v6021_v59 = vld [vmem:[#allocation5 + $0xe40] ss:$8 sps:$4 sm:$0xff]  }
 0x21c   :  { %3814 = vmatpush1.bf16.msra.mxu0 %v5955_v56  ;;  %v6072_v56 = vld [vmem:[#allocation8] ss:$20 sps:$4 sm:$0xff]   ;;  %v6081_v8 = vld [vmem:[#allocation8 + $0x78] ss:$20 sps:$4 sm:$0xff]   ;;  %v6119_v57 = vld [vmem:[#allocation8 + $0x25c] ss:$20 sps:$4 sm:$0xff]  }
 0x21d   :  { %3815 = vmatprep.subr.bf16.mxu0 %v5960_v58  ;;  %v6074_v58 = vld [vmem:[#allocation8 + $0x4] ss:$20 sps:$4 sm:$0xff]   ;;  %v6077_v61 = vld [vmem:[#allocation8 + $0x2c] ss:$20 sps:$4 sm:$0xff]   ;;  %v6116_v54 = vld [vmem:[#allocation8 + $0x234] ss:$20 sps:$4 sm:$0xff]  }
 0x21e   :  { %4500 = vmatprep.subr.bf16.mxu1 %v6074_v58  ;;  %v6111_v58 = vld [vmem:[#allocation8 + $0x208] ss:$20 sps:$4 sm:$0xff]  }
 0x21f   :  { %v6545_v16 = vpop.f32.mrb[8].mxu1 }
 0x220   :  { %3816 = vmatpush1.bf16.msra.mxu0 %v5958_v63  ;;  %v6547_v20 = vpop.f32.mrb[9].mxu1  ;;  %5154 = vmatmul.mubr.msk.bf16.vlgmr.msra.gmra.mrb[16].mxu1 %vm719_vm0, %v6464_v11  ;;  %v5985_v11 = vld [vmem:[#allocation5 + $0xd80] ss:$8 sps:$4 sm:$0xff]   ;;  %v6026_v63 = vld [vmem:[#allocation5 + $0xe54] ss:$8 sps:$4 sm:$0xff]  }
 0x221   :  { %3817 = vmatprep.subr.bf16.mxu0 %v5963_v0  ;;  %v2418_v22 = vpop.f32.mrb[10].mxu1  ;;  %4501 = vmatpush1.bf16.msra.mxu1 %v6072_v56  ;;  %v6075_v0 = vld [vmem:[#allocation8 + $0x28] ss:$20 sps:$4 sm:$0xff]  }
 0x222   :  { %v2419_v23 = vpop.f32.mrb[11].mxu1  ;;  %4502 = vmatprep.subr.bf16.mxu1 %v6077_v61  ;;  %v6038_v22 = vld [vmem:[#allocation5 + $0xe94] ss:$8 sps:$4 sm:$0xff]   ;;  %v6065_v61 = vld [vmem:[#allocation5 + $0xf24] ss:$8 sps:$4 sm:$0xff]  }
 0x223   :  { %v6087_v23 = vld [vmem:[#allocation8 + $0xc8] ss:$20 sps:$4 sm:$0xff]  }
 0x224   :  { %3818 = vmatpush1.bf16.msra.mxu0 %v5961_v2  ;;  %v6080_v2 = vld [vmem:[#allocation8 + $0x54] ss:$20 sps:$4 sm:$0xff]   ;;  %v6062_v56 = vld [vmem:[#allocation5 + $0xf14] ss:$8 sps:$4 sm:$0xff]  }
 0x225   :  { %3819 = vmatprep.subr.bf16.mxu0 %v5966_v3  ;;  %v6024_v3 = vld [vmem:[#allocation5 + $0xe50] ss:$8 sps:$4 sm:$0xff]   ;;  %4503 = vmatpush1.bf16.msra.mxu1 %v6075_v0  ;;  %v6071_v0 = vld [vmem:[#allocation5 + $0xf34] ss:$8 sps:$4 sm:$0xff]  }
 0x226   :  { %4504 = vmatprep.subr.bf16.mxu1 %v6080_v2  ;;  %v6069_v2 = vld [vmem:[#allocation5 + $0xf30] ss:$8 sps:$4 sm:$0xff]  }
 0x228   :  { %3820 = vmatpush1.bf16.msra.mxu0 %v5964_v4  ;;  %v6029_v4 = vld [vmem:[#allocation5 + $0xe64] ss:$8 sps:$4 sm:$0xff]  }
 0x229   :  { %3821 = vmatprep.subr.bf16.mxu0 %v5969_v5  ;;  %v6078_v5 = vld [vmem:[#allocation8 + $0x50] ss:$20 sps:$4 sm:$0xff]  }
 0x22a   :  { %4505 = vmatpush1.bf16.msra.mxu1 %v6078_v5 }
 0x22c   :  { %3822 = vmatpush1.bf16.msra.mxu0 %v5967_v1  ;;  %v6083_v1 = vld [vmem:[#allocation8 + $0x7c] ss:$20 sps:$4 sm:$0xff]  }
 0x22d   :  { %3823 = vmatprep.subr.bf16.mxu0 %v5972_v6  ;;  %v6027_v6 = vld [vmem:[#allocation5 + $0xe60] ss:$8 sps:$4 sm:$0xff]   ;;  %4506 = vmatprep.subr.bf16.mxu1 %v6083_v1 }
 0x22e   :  { %4507 = vmatpush1.bf16.msra.mxu1 %v6081_v8 }
 0x230   :  { %3824 = vmatpush1.bf16.msra.mxu0 %v5970_v7  ;;  %v6032_v7 = vld [vmem:[#allocation5 + $0xe74] ss:$8 sps:$4 sm:$0xff]  }
 0x231   :  { %3834 = vmatprep.subr.bf16.mxu0 %v5975_v52  ;;  %v6035_v52 = vld [vmem:[#allocation5 + $0xe84] ss:$8 sps:$4 sm:$0xff]  }
 0x233   :  { %3826 = vmatmul.mubr.bf16.vlgmr.msra.gmra.mrb[8].mxu0 %v6472_v10  ;;  %v5988_v10 = vld [vmem:[#allocation5 + $0xd90] ss:$8 sps:$4 sm:$0xff]  }
 0x234   :  { %3835 = vmatpush1.bf16.msra.mxu0 %v5973_v14  ;;  %3866 = vmatprep.mubr.bf16.mxu0 %v6476_v37  ;;  %v5991_v37 = vld [vmem:[#allocation5 + $0xda0] ss:$8 sps:$4 sm:$0xff]  }
 0x235   :  { %3836 = vmatprep.subr.bf16.mxu0 %v5978_v18  ;;  %v6089_v14 = vld [vmem:[#allocation8 + $0xcc] ss:$20 sps:$4 sm:$0xff]  }
 0x236   :  { %v6033_v18 = vld [vmem:[#allocation5 + $0xe80] ss:$8 sps:$4 sm:$0xff]  }
 0x238   :  { %3837 = vmatpush1.bf16.msra.mxu0 %v5976_v24  ;;  %v6092_v24 = vld [vmem:[#allocation8 + $0xf4] ss:$20 sps:$4 sm:$0xff]  }
 0x239   :  { %3838 = vmatprep.subr.bf16.mxu0 %v5981_v26  ;;  %v6036_v26 = vld [vmem:[#allocation5 + $0xe90] ss:$8 sps:$4 sm:$0xff]  }
 0x23c   :  { %3839 = vmatpush1.bf16.msra.mxu0 %v5979_v27  ;;  %v6041_v27 = vld [vmem:[#allocation5 + $0xea4] ss:$8 sps:$4 sm:$0xff]  }
 0x23d   :  { %3840 = vmatprep.subr.bf16.mxu0 %v5984_v28  ;;  %v6090_v28 = vld [vmem:[#allocation8 + $0xf0] ss:$20 sps:$4 sm:$0xff]  }
 0x240   :  { %3841 = vmatpush1.bf16.msra.mxu0 %v5982_v29  ;;  %v6095_v29 = vld [vmem:[#allocation8 + $0x11c] ss:$20 sps:$4 sm:$0xff]  }
 0x241   :  { %3842 = vmatprep.subr.bf16.mxu0 %v5987_v31  ;;  %v6039_v31 = vld [vmem:[#allocation5 + $0xea0] ss:$8 sps:$4 sm:$0xff]  }
 0x244   :  { %3843 = vmatpush1.bf16.msra.mxu0 %v5985_v11  ;;  %v6044_v11 = vld [vmem:[#allocation5 + $0xeb4] ss:$8 sps:$4 sm:$0xff]  }
 0x245   :  { %3844 = vmatprep.subr.bf16.mxu0 %v5990_v32  ;;  %v6093_v32 = vld [vmem:[#allocation8 + $0x118] ss:$20 sps:$4 sm:$0xff]  }
 0x248   :  { %3845 = vmatpush1.bf16.msra.mxu0 %v5988_v10  ;;  %v6098_v10 = vld [vmem:[#allocation8 + $0x144] ss:$20 sps:$4 sm:$0xff]  }
 0x249   :  { %3846 = vmatprep.subr.bf16.mxu0 %v5993_v33  ;;  %v6042_v33 = vld [vmem:[#allocation5 + $0xeb0] ss:$8 sps:$4 sm:$0xff]  }
 0x24c   :  { %3847 = vmatpush1.bf16.msra.mxu0 %v5991_v37  ;;  %v6047_v37 = vld [vmem:[#allocation5 + $0xec4] ss:$8 sps:$4 sm:$0xff]  }
 0x24d   :  { %3848 = vmatprep.subr.bf16.mxu0 %v5996_v34  ;;  %v6096_v34 = vld [vmem:[#allocation8 + $0x140] ss:$20 sps:$4 sm:$0xff]  }
 0x250   :  { %3849 = vmatpush1.bf16.msra.mxu0 %v5994_v35  ;;  %v6101_v35 = vld [vmem:[#allocation8 + $0x16c] ss:$20 sps:$4 sm:$0xff]  }
 0x251   :  { %3850 = vmatprep.subr.bf16.mxu0 %v5999_v36  ;;  %v6045_v36 = vld [vmem:[#allocation5 + $0xec0] ss:$8 sps:$4 sm:$0xff]  }
 0x254   :  { %3851 = vmatpush1.bf16.msra.mxu0 %v5997_v38  ;;  %v6050_v38 = vld [vmem:[#allocation5 + $0xed4] ss:$8 sps:$4 sm:$0xff]  }
 0x255   :  { %3852 = vmatprep.subr.bf16.mxu0 %v6002_v39  ;;  %v6099_v39 = vld [vmem:[#allocation8 + $0x168] ss:$20 sps:$4 sm:$0xff]  }
 0x258   :  { %3853 = vmatpush1.bf16.msra.mxu0 %v6000_v41  ;;  %v6104_v41 = vld [vmem:[#allocation8 + $0x194] ss:$20 sps:$4 sm:$0xff]  }
 0x259   :  { %3854 = vmatprep.subr.bf16.mxu0 %v6005_v42  ;;  %v6048_v42 = vld [vmem:[#allocation5 + $0xed0] ss:$8 sps:$4 sm:$0xff]  }
 0x25c   :  { %3855 = vmatpush1.bf16.msra.mxu0 %v6003_v43  ;;  %v6053_v43 = vld [vmem:[#allocation5 + $0xee4] ss:$8 sps:$4 sm:$0xff]  }
 0x25d   :  { %3856 = vmatprep.subr.bf16.mxu0 %v6008_v45  ;;  %v6102_v45 = vld [vmem:[#allocation8 + $0x190] ss:$20 sps:$4 sm:$0xff]  }
 0x260   :  { %3857 = vmatpush1.bf16.msra.mxu0 %v6006_v46  ;;  %v6107_v46 = vld [vmem:[#allocation8 + $0x1bc] ss:$20 sps:$4 sm:$0xff]  }
 0x261   :  { %3858 = vmatprep.subr.bf16.mxu0 %v6011_v13  ;;  %v6051_v13 = vld [vmem:[#allocation5 + $0xee0] ss:$8 sps:$4 sm:$0xff]  }
 0x264   :  { %3859 = vmatpush1.bf16.msra.mxu0 %v6009_v47  ;;  %v6056_v47 = vld [vmem:[#allocation5 + $0xef4] ss:$8 sps:$4 sm:$0xff]  }
 0x265   :  { %3860 = vmatprep.subr.bf16.mxu0 %v6014_v48  ;;  %v6105_v48 = vld [vmem:[#allocation8 + $0x1b8] ss:$20 sps:$4 sm:$0xff]  }
 0x268   :  { %3861 = vmatpush1.bf16.msra.mxu0 %v6012_v49  ;;  %v6110_v49 = vld [vmem:[#allocation8 + $0x1e4] ss:$20 sps:$4 sm:$0xff]  }
 0x269   :  { %3862 = vmatprep.subr.bf16.mxu0 %v6017_v15  ;;  %v6054_v15 = vld [vmem:[#allocation5 + $0xef0] ss:$8 sps:$4 sm:$0xff]  }
 0x26c   :  { %3863 = vmatpush1.bf16.msra.mxu0 %v6015_v50  ;;  %v6059_v50 = vld [vmem:[#allocation5 + $0xf04] ss:$8 sps:$4 sm:$0xff]  }
 0x26d   :  { %3864 = vmatprep.subr.bf16.mxu0 %v6020_v51  ;;  %v6108_v51 = vld [vmem:[#allocation8 + $0x1e0] ss:$20 sps:$4 sm:$0xff]  }
 0x270   :  { %3865 = vmatpush1.bf16.msra.mxu0 %v6018_v53  ;;  %v6113_v53 = vld [vmem:[#allocation8 + $0x20c] ss:$20 sps:$4 sm:$0xff]  }
 0x271   :  { %3875 = vmatprep.subr.bf16.mxu0 %v6023_v55  ;;  %v6057_v55 = vld [vmem:[#allocation5 + $0xf00] ss:$8 sps:$4 sm:$0xff]  }
 0x273   :  { %3867 = vmatmul.mubr.bf16.vlgmr.msra.gmra.mrb[8].mxu0 %v6480_v19  ;;  %v6086_v19 = vld [vmem:[#allocation8 + $0xa4] ss:$20 sps:$4 sm:$0xff]  }
 0x274   :  { %3876 = vmatpush1.bf16.msra.mxu0 %v6021_v59  ;;  %3907 = vmatprep.mubr.bf16.mxu0 %v6482_v25  ;;  %v6084_v25 = vld [vmem:[#allocation8 + $0xa0] ss:$20 sps:$4 sm:$0xff]  }
 0x275   :  { %3877 = vmatprep.subr.bf16.mxu0 %v6026_v63  ;;  %4508 = vmatprep.subr.bf16.mxu1 %v6086_v19  ;;  %v6060_v59 = vld [vmem:[#allocation5 + $0xf10] ss:$8 sps:$4 sm:$0xff]   ;;  %v6063_v63 = vld [vmem:[#allocation5 + $0xf20] ss:$8 sps:$4 sm:$0xff]  }
 0x276   :  { %4509 = vmatpush1.bf16.msra.mxu1 %v6084_v25 }
 0x277   :  { %4510 = vmatprep.subr.bf16.mxu1 %v6089_v14 }
 0x278   :  { %3878 = vmatpush1.bf16.msra.mxu0 %v6024_v3  ;;  %v1755_v3 = vld [vmem:[#allocation7 + $0x4] sm:$0x3] }
 0x279   :  { %3879 = vmatprep.subr.bf16.mxu0 %v6029_v4  ;;  %v1760_v4 = vrot.slane %v1755_v3, %v6517_v17  ;;  %v1764_v5 = vrot.slane %v1755_v3, %v6520_v21  ;;  %v6143_v3 = vld [vmem:[#allocation8 + $0x124] ss:$20 sps:$4 sm:$0xff]  }
 0x27a   :  { %4511 = vmatpush1.bf16.msra.mxu1 %v6087_v23 }
 0x27b   :  { %4512 = vmatprep.subr.bf16.mxu1 %v6092_v24 }
 0x27c   :  { %3880 = vmatpush1.bf16.msra.mxu0 %v6027_v6 }
 0x27d   :  { %3881 = vmatprep.subr.bf16.mxu0 %v6032_v7 }
 0x27e   :  { %4513 = vmatpush1.bf16.msra.mxu1 %v6090_v28 }
 0x27f   :  { %4514 = vmatprep.subr.bf16.mxu1 %v6095_v29 }
 0x280   :  { %3882 = vmatpush1.bf16.msra.mxu0 %v6030_v12 }
 0x281   :  { %3883 = vmatprep.subr.bf16.mxu0 %v6035_v52 }
 0x282   :  { %4515 = vmatpush1.bf16.msra.mxu1 %v6093_v32  ;;  %v6114_v32 = vld [vmem:[#allocation8 + $0x230] ss:$20 sps:$4 sm:$0xff]  }
 0x283   :  { %4516 = vmatprep.subr.bf16.mxu1 %v6098_v10  ;;  %v6122_v10 = vld [vmem:[#allocation8 + $0xc] ss:$20 sps:$4 sm:$0xff]  }
 0x284   :  { %3884 = vmatpush1.bf16.msra.mxu0 %v6033_v18  ;;  %v2523_v18 = vld [vmem:[#allocation7 + $0x6] sm:$0x3] }
 0x285   :  { %3885 = vmatprep.subr.bf16.mxu0 %v6038_v22  ;;  %v2528_v22 = vrot.slane %v2523_v18, %v6517_v17  ;;  %v2532_v23 = vrot.slane %v2523_v18, %v6520_v21  ;;  %v6159_v18 = vld [vmem:[#allocation8 + $0x210] ss:$20 sps:$4 sm:$0xff]  }
 0x286   :  { %4517 = vmatpush1.bf16.msra.mxu1 %v6096_v34 }
 0x287   :  { %4518 = vmatprep.subr.bf16.mxu1 %v6101_v35 }
 0x288   :  { %3886 = vmatpush1.bf16.msra.mxu0 %v6036_v26 }
 0x289   :  { %3887 = vmatprep.subr.bf16.mxu0 %v6041_v27 }
 0x28a   :  { %4519 = vmatpush1.bf16.msra.mxu1 %v6099_v39 }
 0x28b   :  { %4520 = vmatprep.subr.bf16.mxu1 %v6104_v41 }
 0x28c   :  { %3888 = vmatpush1.bf16.msra.mxu0 %v6039_v31 }
 0x28d   :  { %3889 = vmatprep.subr.bf16.mxu0 %v6044_v11 }
 0x28e   :  { %4521 = vmatpush1.bf16.msra.mxu1 %v6102_v45 }
 0x28f   :  { %4522 = vmatprep.subr.bf16.mxu1 %v6107_v46 }
 0x290   :  { %3890 = vmatpush1.bf16.msra.mxu0 %v6042_v33  ;;  %v3291_v33 = vld [vmem:[#allocation7 + $0x8] sm:$0x3] }
 0x291   :  { %3891 = vmatprep.subr.bf16.mxu0 %v6047_v37  ;;  %v3296_v37 = vrot.slane %v3291_v33, %v6517_v17  ;;  %v3300_v34 = vrot.slane %v3291_v33, %v6520_v21  ;;  %v6183_v33 = vld [vmem:[#allocation8 + $0x128] ss:$20 sps:$4 sm:$0xff]  }
 0x292   :  { %4523 = vmatpush1.bf16.msra.mxu1 %v6105_v48  ;;  %v6120_v48 = vld [vmem:[#allocation8 + $0x8] ss:$20 sps:$4 sm:$0xff]  }
 0x293   :  { %4524 = vmatprep.subr.bf16.mxu1 %v6110_v49 }
 0x294   :  { %3892 = vmatpush1.bf16.msra.mxu0 %v6045_v36 }
 0x295   :  { %3893 = vmatprep.subr.bf16.mxu0 %v6050_v38 }
 0x296   :  { %4525 = vmatpush1.bf16.msra.mxu1 %v6108_v51  ;;  %v6128_v51 = vld [vmem:[#allocation8 + $0x5c] ss:$20 sps:$4 sm:$0xff]  }
 0x297   :  { %4526 = vmatprep.subr.bf16.mxu1 %v6113_v53  ;;  %v6126_v53 = vld [vmem:[#allocation8 + $0x58] ss:$20 sps:$4 sm:$0xff]  }
 0x298   :  { %3894 = vmatpush1.bf16.msra.mxu0 %v6048_v42 }
 0x299   :  { %3895 = vmatprep.subr.bf16.mxu0 %v6053_v43 }
 0x29a   :  { %4527 = vmatpush1.bf16.msra.mxu1 %v6111_v58  ;;  %v6134_v58 = vld [vmem:[#allocation8 + $0xac] ss:$20 sps:$4 sm:$0xff]  }
 0x29b   :  { %4528 = vmatprep.subr.bf16.mxu1 %v6116_v54  ;;  %v6176_v54 = vld [vmem:[#allocation8 + $0x1f0] ss:$20 sps:$4 sm:$0xff]  }
 0x29c   :  { %3896 = vmatpush1.bf16.msra.mxu0 %v6051_v13 }
 0x29d   :  { %3897 = vmatprep.subr.bf16.mxu0 %v6056_v47 }
 0x29e   :  { %4529 = vmatpush1.bf16.msra.mxu1 %v6114_v32  ;;  %v6178_v32 = vld [vmem:[#allocation8 + $0x218] ss:$20 sps:$4 sm:$0xff]  }
 0x29f   :  { %4530 = vmatprep.subr.bf16.mxu1 %v6119_v57  ;;  %v6180_v57 = vld [vmem:[#allocation8 + $0x240] ss:$20 sps:$4 sm:$0xff]  }
 0x2a0   :  { %3898 = vmatpush1.bf16.msra.mxu0 %v6054_v15  ;;  %v6125_v15 = vld [vmem:[#allocation8 + $0x34] ss:$20 sps:$4 sm:$0xff]  }
 0x2a1   :  { %3899 = vmatprep.subr.bf16.mxu0 %v6059_v50  ;;  %v6123_v50 = vld [vmem:[#allocation8 + $0x30] ss:$20 sps:$4 sm:$0xff]  }
 0x2a4   :  { %3900 = vmatpush1.bf16.msra.mxu0 %v6057_v55  ;;  %v6131_v55 = vld [vmem:[#allocation8 + $0x84] ss:$20 sps:$4 sm:$0xff]  }
 0x2a5   :  { %3901 = vmatprep.subr.bf16.mxu0 %v6062_v56  ;;  %v6129_v56 = vld [vmem:[#allocation8 + $0x80] ss:$20 sps:$4 sm:$0xff]  }
 0x2a8   :  { %3902 = vmatpush1.bf16.msra.mxu0 %v6060_v59  ;;  %v6132_v59 = vld [vmem:[#allocation8 + $0xa8] ss:$20 sps:$4 sm:$0xff]  }
 0x2a9   :  { %3903 = vmatprep.subr.bf16.mxu0 %v6065_v61  ;;  %v6137_v61 = vld [vmem:[#allocation8 + $0xd4] ss:$20 sps:$4 sm:$0xff]  }
 0x2ac   :  { %3904 = vmatpush1.bf16.msra.mxu0 %v6063_v63  ;;  %v6135_v63 = vld [vmem:[#allocation8 + $0xd0] ss:$20 sps:$4 sm:$0xff]  }
 0x2ad   :  { %3905 = vmatprep.subr.bf16.mxu0 %v6071_v0  ;;  %v6140_v0 = vld [vmem:[#allocation8 + $0xfc] ss:$20 sps:$4 sm:$0xff]  }
 0x2b0   :  { %3906 = vmatpush1.bf16.msra.mxu0 %v6069_v2  ;;  %v6138_v2 = vld [vmem:[#allocation8 + $0xf8] ss:$20 sps:$4 sm:$0xff]  }
 0x2b3   :  { %3908 = vmatmul.mubr.bf16.vlgmr.msra.gmra.mrb[8].mxu0 %v6488_v30 }
 0x2c6   :  { %v2373_v1 = vpop.f32.mrb[4].mxu0 }
 0x2c7   :  { %v5266_v6 = vadd.f32 %v2373_v1, %v1760_v4  ;;  %v2375_v7 = vpop.f32.mrb[5].mxu0  ;;  %v6141_v4 = vld [vmem:[#allocation8 + $0x120] ss:$20 sps:$4 sm:$0xff]   ;;  %v6144_v1 = vld [vmem:[#allocation8 + $0x148] ss:$20 sps:$4 sm:$0xff]  }
 0x2c8   :  { %v5268_v8 = vadd.f32 %v2375_v7, %v1764_v5  ;;  %v2377_v19 = vpop.f32.mrb[6].mxu0  ;;  %v6146_v5 = vld [vmem:[#allocation8 + $0x14c] ss:$20 sps:$4 sm:$0xff]   ;;  %v6147_v7 = vld [vmem:[#allocation8 + $0x170] ss:$20 sps:$4 sm:$0xff]  }
 0x2c9   :  { %v5267_v12 = vadd.f32 %v5266_v6, %v6545_v16  ;;  %v2378_v52 = vpop.f32.mrb[7].mxu0  ;;  %v6149_v6 = vld [vmem:[#allocation8 + $0x174] ss:$20 sps:$4 sm:$0xff]   ;;  %v6150_v19 = vld [vmem:[#allocation8 + $0x198] ss:$20 sps:$4 sm:$0xff]  }
 0x2ca   :  { %v5269_v25 = vadd.f32 %v5268_v8, %v6547_v20  ;;  %v6152_v8 = vld [vmem:[#allocation8 + $0x19c] ss:$20 sps:$4 sm:$0xff]   ;;  %v6153_v52 = vld [vmem:[#allocation8 + $0x1c0] ss:$20 sps:$4 sm:$0xff]  }
 0x2cb   :  { %v2421_v14 = vmax.f32 %v1653_v60, %v5267_v12  ;;  %v6155_v12 = vld [vmem:[#allocation8 + $0x1c4] ss:$20 sps:$4 sm:$0xff]  }
 0x2cc   :  { %v2422_v30 = vmax.f32 %v1654_v62, %v5269_v25  ;;  %v6117_v62 = vld [vmem:[#allocation8 + $0x258] ss:$20 sps:$4 sm:$0xff]  }
 0x2cd   :  { %4531 = vmatpush1.bf16.msra.mxu1 %v6117_v62  ;;  %v6158_v25 = vld [vmem:[#allocation8 + $0x1ec] ss:$20 sps:$4 sm:$0xff]  }
 0x2ce   :  { %4541 = vmatprep.subr.bf16.mxu1 %v6122_v10  ;;  %v6181_v62 = vld [vmem:[#allocation8 + $0x100] ss:$20 sps:$4 sm:$0xff]   ;;  %v6182_v10 = vld [vmem:[#allocation8 + $0x268] ss:$20 sps:$4 sm:$0xff]  }
 0x2eb   :  { %v3182_v24 = vpop.f32.mrb[12].mxu1 }
 0x2ec   :  { %v5270_v26 = vadd.f32 %v3182_v24, %v2528_v22  ;;  %v3184_v27 = vpop.f32.mrb[13].mxu1  ;;  %v6164_v22 = vld [vmem:[#allocation8 + $0x23c] ss:$20 sps:$4 sm:$0xff]   ;;  %v6167_v24 = vld [vmem:[#allocation8 + $0x264] ss:$20 sps:$4 sm:$0xff]  }
 0x2ed   :  { %v5271_v16 = vadd.f32 %v3184_v27, %v2532_v23  ;;  %v3186_v28 = vpop.f32.mrb[14].mxu1  ;;  %v6162_v23 = vld [vmem:[#allocation8 + $0x238] ss:$20 sps:$4 sm:$0xff]   ;;  %v6168_v27 = vld [vmem:[#allocation8 + $0x150] ss:$20 sps:$4 sm:$0xff]  }
 0x2ee   :  { %v3189_v29 = vmax.f32 %v2421_v14, %v5270_v26  ;;  %v3187_v20 = vpop.f32.mrb[15].mxu1  ;;  %v6156_v14 = vld [vmem:[#allocation8 + $0x1e8] ss:$20 sps:$4 sm:$0xff]   ;;  %v6165_v26 = vld [vmem:[#allocation8 + $0x260] ss:$20 sps:$4 sm:$0xff]  }
 0x2ef   :  { %v3190_v31 = vmax.f32 %v2422_v30, %v5271_v16  ;;  %v6161_v30 = vld [vmem:[#allocation8 + $0x214] ss:$20 sps:$4 sm:$0xff]   ;;  %v6169_v16 = vld [vmem:[#allocation8 + $0x10] ss:$20 sps:$4 sm:$0xff]   ;;  %v6170_v28 = vld [vmem:[#allocation8 + $0x178] ss:$20 sps:$4 sm:$0xff]  }
 0x2f0   :  { %v6172_v20 = vld [vmem:[#allocation8 + $0x1a0] ss:$20 sps:$4 sm:$0xff]  }
 0x2f3   :  { %v3950_v11 = vpop.f32.mrb[16].mxu1 }
 0x2f4   :  { %v3952_v40 = vpop.f32.mrb[17].mxu1 }
 0x2f5   :  { %v3954_v60 = vpop.f32.mrb[18].mxu1 }
 0x2f6   :  { %v3955_v44 = vpop.f32.mrb[19].mxu1  ;;  %v6177_v60 = vld [vmem:[#allocation8 + $0xb0] ss:$20 sps:$4 sm:$0xff]  }
 0x2f7   :  { %v6179_v44 = vld [vmem:[#allocation8 + $0xd8] ss:$20 sps:$4 sm:$0xff]  }
 0x386   :  { %v3909_v35 = vpop.f32.mrb[8].mxu0 }
 0x387   :  { %v5272_v36 = vadd.f32 %v3909_v35, %v3296_v37  ;;  %v3911_v38 = vpop.f32.mrb[9].mxu0  ;;  %v4057_v37 = vld [vmem:[#allocation10] sm:$0x1f] }
 0x388   :  { %v5274_v39 = vadd.f32 %v3911_v38, %v3300_v34  ;;  %v3913_v41 = vpop.f32.mrb[10].mxu0  ;;  %v4062_v34 = vrot.slane %v4057_v37, %v6517_v17  ;;  %v4066_v35 = vrot.slane %v4057_v37, %v6520_v21 }
 0x389   :  { %v5273_v42 = vadd.f32 %v5272_v36, %v3950_v11  ;;  %v3914_v43 = vpop.f32.mrb[11].mxu0  ;;  %v6174_v11 = vld [vmem:[#allocation8 + $0x1c8] ss:$20 sps:$4 sm:$0xff]  }
 0x38a   :  { %v5275_v45 = vadd.f32 %v5274_v39, %v3952_v40  ;;  %v6175_v40 = vld [vmem:[#allocation8 + $0x88] ss:$20 sps:$4 sm:$0xff]  }
 0x38b   :  { %v3957_v46 = vmax.f32 %v3189_v29, %v5273_v42  ;;  %v6171_v29 = vld [vmem:[#allocation8 + $0x38] ss:$20 sps:$4 sm:$0xff]  }
 0x38c   :  { %v3958_v13 = vmax.f32 %v3190_v31, %v5275_v45  ;;  %v6173_v31 = vld [vmem:[#allocation8 + $0x60] ss:$20 sps:$4 sm:$0xff]  }
 0x38d   :  { %v6572_v49 = vpack.c.bf16 %v3957_v46, %v3957_v46  ;;  %v4069_v46 = vsub.s32 2, %v6514_v9 }
 0x38e   :  { %v6570_v47 = vpack.c.bf16 %v3958_v13, %v3958_v13  ;;  %v4073_v13 = vsub.s32 3, %v6514_v9 }
 0x390   :  { %4532 = vmatprep.mubr.bf16.mxu1 %v6570_v47 }
 0x391   :  { %4533 = vmatmul.mubr.bf16.vlgmr.msra.gmra.mrb[20].mxu1 %v6572_v49 }
 0x392   :  { %4542 = vmatpush1.bf16.msra.mxu1 %v6120_v48  ;;  %4573 = vmatprep.mubr.bf16.mxu1 %v6570_v47  ;;  %v4074_v48 = vrot.slane %v4057_v37, %v4073_v13 }
 0x393   :  { %4543 = vmatprep.subr.bf16.mxu1 %v6125_v15 }
 0x396   :  { %4544 = vmatpush1.bf16.msra.mxu1 %v6123_v50 }
 0x397   :  { %4545 = vmatprep.subr.bf16.mxu1 %v6128_v51 }
 0x39a   :  { %4546 = vmatpush1.bf16.msra.mxu1 %v6126_v53 }
 0x39b   :  { %4547 = vmatprep.subr.bf16.mxu1 %v6131_v55 }
 0x39e   :  { %4548 = vmatpush1.bf16.msra.mxu1 %v6129_v56  ;;  %v4077_v56 = vsub.s32 4, %v6514_v9 }
 0x39f   :  { %4549 = vmatprep.subr.bf16.mxu1 %v6134_v58 }
 0x3a2   :  { %4550 = vmatpush1.bf16.msra.mxu1 %v6132_v59  ;;  %v4078_v59 = vrot.slane %v4057_v37, %v4077_v56 }
 0x3a3   :  { %4551 = vmatprep.subr.bf16.mxu1 %v6137_v61 }
 0x3a6   :  { %4552 = vmatpush1.bf16.msra.mxu1 %v6135_v63 }
 0x3a7   :  { %4553 = vmatprep.subr.bf16.mxu1 %v6140_v0 }
 0x3aa   :  { %4554 = vmatpush1.bf16.msra.mxu1 %v6138_v2 }
 0x3ab   :  { %4555 = vmatprep.subr.bf16.mxu1 %v6143_v3 }
 0x3ae   :  { %4556 = vmatpush1.bf16.msra.mxu1 %v6141_v4  ;;  %v5235_v4 = vld [vmem:[#allocation11] ss:$0 sm:$0xff] }
 0x3af   :  { %4557 = vmatprep.subr.bf16.mxu1 %v6146_v5 }
 0x3b2   :  { %4558 = vmatpush1.bf16.msra.mxu1 %v6144_v1 }
 0x3b3   :  { %4559 = vmatprep.subr.bf16.mxu1 %v6149_v6  ;;  %v5236_v6 = vld [vmem:[#allocation2] ss:$0 sm:$0xff] }
 0x3b6   :  { %4560 = vmatpush1.bf16.msra.mxu1 %v6147_v7 }
 0x3b7   :  { %4561 = vmatprep.subr.bf16.mxu1 %v6152_v8 }
 0x3ba   :  { %4562 = vmatpush1.bf16.msra.mxu1 %v6150_v19 }
 0x3bb   :  { %4563 = vmatprep.subr.bf16.mxu1 %v6155_v12 }
 0x3be   :  { %4564 = vmatpush1.bf16.msra.mxu1 %v6153_v52 }
 0x3bf   :  { %4565 = vmatprep.subr.bf16.mxu1 %v6158_v25 }
 0x3c2   :  { %4566 = vmatpush1.bf16.msra.mxu1 %v6156_v14 }
 0x3c3   :  { %4567 = vmatprep.subr.bf16.mxu1 %v6161_v30 }
 0x3c6   :  { %4568 = vmatpush1.bf16.msra.mxu1 %v6159_v18 }
 0x3c7   :  { %4569 = vmatprep.subr.bf16.mxu1 %v6164_v22 }
 0x3ca   :  { %4570 = vmatpush1.bf16.msra.mxu1 %v6162_v23 }
 0x3cb   :  { %4571 = vmatprep.subr.bf16.mxu1 %v6167_v24 }
 0x3ce   :  { %4572 = vmatpush1.bf16.msra.mxu1 %v6165_v26 }
 0x3cf   :  { %5238 = vmatprep.subr.bf16.mxu1 %v6168_v27 }
 0x3d1   :  { %4574 = vmatmul.mubr.bf16.vlgmr.msra.gmra.mrb[24].mxu1 %v6572_v49 }
 0x3d2   :  { %5239 = vmatpush3.bf16.msra.mxu1 %v6169_v16  ;;  %4614 = vmatprep.mubr.bf16.mxu1 %v6570_v47  ;;  %v4070_v47 = vrot.slane %v4057_v37, %v4069_v46 }
 0x3d3   :  { %5240 = vmatprep.subr.bf16.mxu1 %v6170_v28 }
 0x3d6   :  { %5241 = vmatpush3.bf16.msra.mxu1 %v6171_v29 }
 0x3d7   :  { %5242 = vmatprep.subr.bf16.mxu1 %v6172_v20 }
 0x3da   :  { %5243 = vmatpush3.bf16.msra.mxu1 %v6173_v31 }
 0x3db   :  { %5244 = vmatprep.subr.bf16.mxu1 %v6174_v11 }
 0x3de   :  { %5245 = vmatpush3.bf16.msra.mxu1 %v6175_v40 }
 0x3df   :  { %5246 = vmatprep.subr.bf16.mxu1 %v6176_v54 }
 0x3e2   :  { %5247 = vmatpush3.bf16.msra.mxu1 %v6177_v60 }
 0x3e3   :  { %5248 = vmatprep.subr.bf16.mxu1 %v6178_v32 }
 0x3e6   :  { %5249 = vmatpush3.bf16.msra.mxu1 %v6179_v44 }
 0x3e7   :  { %5250 = vmatprep.subr.bf16.mxu1 %v6180_v57 }
 0x3ea   :  { %5251 = vmatpush3.bf16.msra.mxu1 %v6181_v62 }
 0x3eb   :  { %5252 = vmatprep.subr.bf16.mxu1 %v6182_v10 }
 0x3ee   :  { %5253 = vmatpush3.bf16.msra.mxu1 %v6183_v33 }
 0x3f1   :  { %4615 = vmatmul.mubr.bf16.vlgmr.msra.gmra.mrb[28].mxu1 %v6572_v49 }
 0x464   :  { %v4534_v36 = vpop.f32.mrb[20].mxu1 }
 0x465   :  { %v4535_v38 = vadd.f32 %v4534_v36, %v4062_v34  ;;  %v4536_v39 = vpop.f32.mrb[21].mxu1 }
 0x466   :  { %v4537_v41 = vadd.f32 %v4536_v39, %v4066_v35  ;;  %v4538_v42 = vpop.f32.mrb[22].mxu1 }
 0x467   :  { %v4539_v43 = vpop.f32.mrb[23].mxu1 }
 0x468   :  { %v4622_v45 = vmax.f32 %v4535_v38, %v4537_v41 }
 0x4a4   :  { %v4575_v15 = vpop.f32.mrb[24].mxu1 }
 0x4a5   :  { %v4576_v49 = vadd.f32 %v4575_v15, %v4070_v47  ;;  %v4577_v50 = vpop.f32.mrb[25].mxu1 }
 0x4a6   :  { %v4578_v51 = vadd.f32 %v4577_v50, %v4074_v48  ;;  %v4579_v17 = vpop.f32.mrb[26].mxu1 }
 0x4a7   :  { %v4623_v53 = vmax.f32 %v4622_v45, %v4576_v49  ;;  %v4580_v21 = vpop.f32.mrb[27].mxu1 }
 0x4a9   :  { %v4624_v55 = vmax.f32 %v4623_v53, %v4578_v51 }
 0x4c4   :  { %v5254_v58 = vpop.f32.mrb[28].mxu1 }
 0x4c5   :  { %v5255_v61 = vpop.f32.mrb[29].mxu1 }
 0x4c6   :  { %v5256_v63 = vadd.f32 %v5255_v61, %v5254_v58  ;;  %v5257_v0 = vpop.f32.mrb[30].mxu1 }
 0x4c7   :  { %v5258_v2 = vpop.f32.mrb[31].mxu1 }
 0x4c8   :  { %v4617_v3 = vadd.f32 %v5256_v63, %v4078_v59 }
 0x4ca   :  { %v4625_v5 = vmax.f32 %v4624_v55, %v4617_v3 }
 0x4cc   :  { %v4633_v1 = vmul.f32 %v5235_v4, %v4625_v5 }
 0x4ce   :  { %4634 = vadd.xlane.f32.xlu0 %v4633_v1 }
 0x55b   :  { %v4635_v7 = vpop.xlane.xlu0 %4634 }
 0x55c   :  { %v4643_v8 = vadd.f32 %v5236_v6, %v4635_v7 }
 0x55e   :  { %v5237_v19 = vmul.f32 -1.442695, %v4643_v8 }
 0x560   :  { %6184 = vpow2.f32 %v5237_v19 }
 0x56a   :  { %v6185_v12 = vpop.eup %6184 }
 0x56b   :  { %v4647_v52 = vadd.f32 1.0, %v6185_v12 }
 0x56d   :  { %6186 = vrcp.f32 %v4647_v52 }
 0x577   :  { %v6187_v9 = vpop.eup %6186 }
 0x578   :  { %4651 = vst.msk [vmem:[%s6595_s7] sm:$0xff] %vm4650_vm1, %v6187_v9 }
 0x579   :  { %4656 = vsyncpa [#allocation4], 1 }
 0x57a   :  { %4657 = vsyncpa [#allocation6], 1 }
 0x57b   :  { %4658 = vsyncpa [#allocation9], 1 }
 0x57c   :  { %4659 = vsyncpa [#allocation12], 1 }

</bundles_post_ra>
